<compile_context>
chip_gen: v7x
topology: tpu7x:2x2x1
jax: 0.10.0
libtpu: 0.0.40
codegen_flags: <defaults>
</compile_context>

<pallas_src>
import math

import jax
import jax.numpy as jnp
from jax import lax
from jax.experimental import pallas as pl
from jax.experimental.pallas import tpu as pltpu

NEG_INF = -1e30  # finite "-inf" baked into padded bias columns of the o2o bias


def _round_up(n, m):
    return ((n + m - 1) // m) * m


# ---------------------------------------------------------------------------
# Kernel factory: one grid step == TB RNN time steps.  Weights are resident;
# the carried state z = [hidden | o1 | 0-pad] lives in VMEM scratch.
# ---------------------------------------------------------------------------
def make_rnn_kernel(t_real, tb, b_pad, z_pad, o_pad):
    unroll = tb <= 8  # give LLO full visibility on short fixed trip counts

    def rnn_kernel(ci_ref, h0_ref, w_ci_ref, w_hz_ref, b1_ref, w2_ref, b2_ref,
                   out_ref, hid_out_ref, z_scratch):
        blk = pl.program_id(0)

        @pl.when(blk == 0)
        def _():
            # z_scratch[:, :H] = hidden0, rest zeros (provided pre-padded).
            z_scratch[...] = h0_ref[...]

        # Resident weights: read once per block, reused for all TB steps.
        w_ci = w_ci_ref[...]
        w_hz = w_hz_ref[...]
        w2 = w2_ref[...]
        # Hoist bias broadcasts out of the time loop.
        b1 = jnp.broadcast_to(b1_ref[...], (b_pad, z_pad))
        b2 = jnp.broadcast_to(b2_ref[...], (b_pad, o_pad))

        def step(i, carry):
            ci = ci_ref[i]            # (B_pad, CI_pad) = [category | input | 0-pad]
            z_prev = z_scratch[...]   # (B_pad, Z_pad);  z_prev[:, :H] == hidden

            # Fused i2h + i2o:  z = [hidden' | o1]  (padded cols stay exactly 0
            # because padded weight rows/cols and bias are zero).
            z = (jnp.dot(ci, w_ci, preferred_element_type=jnp.float32)
                 + jnp.dot(z_prev, w_hz, preferred_element_type=jnp.float32)
                 + b1)

            # o2o(cat([hidden', o1])) == z @ W2 ; padded logit cols get NEG_INF.
            logits = jnp.dot(z, w2, preferred_element_type=jnp.float32) + b2

            # TODO(synk): nn.Dropout(0.1) is implemented as eval-mode identity;
            # training-mode masking (pltpu.prng_seed + pltpu.stateful_bernoulli)
            # is not reproduced here.

            # log_softmax over features; padded cols contribute exp(~-1e30) == 0.
            m = jnp.max(logits, axis=1, keepdims=True)
            shifted = logits - m
            lse = jnp.log(jnp.sum(jnp.exp(shifted), axis=1, keepdims=True))
            out_ref[i] = shifted - lse

            z_scratch[...] = z

            # Capture the hidden state exactly at the real last time step
            # (padded tail steps, if any, never overwrite it).
            t_global = blk * tb + i

            @pl.when(t_global == t_real - 1)
            def _():
                hid_out_ref[...] = z   # wrapper slices [:B, :H] -> hidden'

            return carry

        lax.fori_loop(0, tb, step, 0, unroll=unroll)

    return rnn_kernel


# ---------------------------------------------------------------------------
# Parameter packing: fuse + pad once, outside the kernel.
# ---------------------------------------------------------------------------
def pack_params(params, n_categories, input_size, hidden_size, output_size):
    nc, ni, H, O = n_categories, input_size, hidden_size, output_size
    CI, Z = nc + ni, H + O
    CI_pad, Z_pad, O_pad = _round_up(CI, 128), _round_up(Z, 128), _round_up(O, 128)

    # Fuse i2h / i2o along the output axis; split rows into [cat|inp] vs hidden.
    w1 = jnp.concatenate([params["w_i2h"], params["w_i2o"]], axis=1)  # (nc+ni+H, Z)
    b1 = jnp.concatenate([params["b_i2h"], params["b_i2o"]], axis=1)  # (1, Z)

    w_ci = jnp.zeros((CI_pad, Z_pad), jnp.float32).at[:CI, :Z].set(w1[:CI])
    w_hz = jnp.zeros((Z_pad, Z_pad), jnp.float32).at[:H, :Z].set(w1[CI:])
    b1p = jnp.zeros((1, Z_pad), jnp.float32).at[:, :Z].set(b1)
    w2 = jnp.zeros((Z_pad, O_pad), jnp.float32).at[:Z, :O].set(params["w_o2o"])
    b2p = jnp.full((1, O_pad), NEG_INF, jnp.float32).at[:, :O].set(params["b_o2o"])

    dims = {"CI_pad": CI_pad, "Z_pad": Z_pad, "O_pad": O_pad}
    return (w_ci, w_hz, b1p, w2, b2p), dims


# ---------------------------------------------------------------------------
# Wrappers
# ---------------------------------------------------------------------------
def rnn_sequence_forward(categories, inputs, hidden0, params, *, time_block=16):
    """Run T RNN steps in a single kernel launch.

    categories: (T, B, n_categories), inputs: (T, B, input_size),
    hidden0: (B, hidden_size).  Returns (log_probs (T, B, O), hidden_T (B, H)).
    """
    T, B, nc = categories.shape
    ni = inputs.shape[-1]
    H = hidden0.shape[-1]
    O = params["w_o2o"].shape[1]

    (w_ci, w_hz, b1p, w2, b2p), d = pack_params(params, nc, ni, H, O)
    CI_pad, Z_pad, O_pad = d["CI_pad"], d["Z_pad"], d["O_pad"]
    B_pad = _round_up(max(B, 8), 8)

    TB = min(T, time_block)
    T_pad = _round_up(T, TB)
    n_blocks = T_pad // TB

    # Per-step streamed activation: [category | input | 0-pad], batch padded to 8,
    # time padded to a multiple of TB (tail steps are zeros -> finite garbage,
    # sliced away; final hidden is captured at the real step T-1).
    ci_seq = jnp.zeros((T_pad, B_pad, CI_pad), jnp.float32)
    ci_seq = ci_seq.at[:T, :B, :nc].set(categories)
    ci_seq = ci_seq.at[:T, :B, nc:nc + ni].set(inputs)
    h0 = jnp.zeros((B_pad, Z_pad), jnp.float32).at[:B, :H].set(hidden0)

    flops = 2 * T_pad * B_pad * (CI_pad * Z_pad + Z_pad * Z_pad + Z_pad * O_pad)
    transcendentals = T_pad * B_pad * (O_pad + 1)
    bytes_accessed = 4 * (ci_seq.size + h0.size + w_ci.size + w_hz.size
                          + b1p.size + w2.size + b2p.size
                          + T_pad * B_pad * O_pad + B_pad * Z_pad)

    kernel = make_rnn_kernel(T, TB, B_pad, Z_pad, O_pad)

    out_pad, hid_pad = pl.pallas_call(
        kernel,
        out_shape=(
            jax.ShapeDtypeStruct((T_pad, B_pad, O_pad), jnp.float32),
            jax.ShapeDtypeStruct((B_pad, Z_pad), jnp.float32),
        ),
        grid=(n_blocks,),
        in_specs=[
            pl.BlockSpec((TB, B_pad, CI_pad), lambda t: (t, 0, 0)),  # streamed [cat|inp]
            pl.BlockSpec((B_pad, Z_pad), lambda t: (0, 0)),          # hidden0 (resident)
            pl.BlockSpec((CI_pad, Z_pad), lambda t: (0, 0)),         # fused W for [cat|inp]
            pl.BlockSpec((Z_pad, Z_pad), lambda t: (0, 0)),          # fused W for hidden carry
            pl.BlockSpec((1, Z_pad), lambda t: (0, 0)),              # fused i2h/i2o bias
            pl.BlockSpec((Z_pad, O_pad), lambda t: (0, 0)),          # o2o weight
            pl.BlockSpec((1, O_pad), lambda t: (0, 0)),              # o2o bias (NEG_INF pad)
        ],
        out_specs=(
            pl.BlockSpec((TB, B_pad, O_pad), lambda t: (t, 0, 0)),   # per-step log-probs
            pl.BlockSpec((B_pad, Z_pad), lambda t: (0, 0)),          # final state (resident)
        ),
        scratch_shapes=[pltpu.VMEM((B_pad, Z_pad), jnp.float32)],    # hidden/z carry
        compiler_params=pltpu.CompilerParams(
            dimension_semantics=("arbitrary",)),                     # serial recurrence
        cost_estimate=pl.CostEstimate(
            flops=flops, transcendentals=transcendentals,
            bytes_accessed=bytes_accessed),
    )(ci_seq, h0, w_ci, w_hz, b1p, w2, b2p)

    return out_pad[:T, :B, :O], hid_pad[:B, :H]


def rnn_forward(category, inp, hidden, params):
    """Single step, matching RNN.forward(category, input, hidden)."""
    out_seq, hidden_new = rnn_sequence_forward(category[None], inp[None], hidden, params)
    return out_seq[0], hidden_new


# ---------------------------------------------------------------------------
# Init + pure-JAX reference
# ---------------------------------------------------------------------------
def init_params(key, n_categories, input_size, hidden_size, output_size):
    """nn.Linear-style init (uniform +/- 1/sqrt(fan_in)); weights stored (in, out)."""
    c_in1 = n_categories + input_size + hidden_size
    c_in2 = hidden_size + output_size
    b1 = 1.0 / math.sqrt(c_in1)
    b2 = 1.0 / math.sqrt(c_in2)
    ks = jax.random.split(key, 6)
    return {
        "w_i2h": jax.random.uniform(ks[0], (c_in1, hidden_size), jnp.float32, -b1, b1),
        "b_i2h": jax.random.uniform(ks[1], (1, hidden_size), jnp.float32, -b1, b1),
        "w_i2o": jax.random.uniform(ks[2], (c_in1, output_size), jnp.float32, -b1, b1),
        "b_i2o": jax.random.uniform(ks[3], (1, output_size), jnp.float32, -b1, b1),
        "w_o2o": jax.random.uniform(ks[4], (c_in2, output_size), jnp.float32, -b2, b2),
        "b_o2o": jax.random.uniform(ks[5], (1, output_size), jnp.float32, -b2, b2),
    }


def rnn_step_ref(category, inp, hidden, params):
    """Pure-JAX reference of the original forward (no Pallas)."""
    combined = jnp.concatenate([category, inp, hidden], axis=1)
    hidden_new = combined @ params["w_i2h"] + params["b_i2h"]
    o1 = combined @ params["w_i2o"] + params["b_i2o"]
    out = jnp.concatenate([hidden_new, o1], axis=1) @ params["w_o2o"] + params["b_o2o"]
    return jax.nn.log_softmax(out, axis=1), hidden_new


if __name__ == "__main__":
    B, T = 2, 8
    N_CATEGORIES = 8
    INPUT_SIZE = 16    # n_letters in the original script
    HIDDEN_SIZE = 32
    OUTPUT_SIZE = 16   # n_letters in the original script

    key = jax.random.PRNGKey(0)
    k_param, k_cat, k_inp = jax.random.split(key, 3)
    params = init_params(k_param, N_CATEGORIES, INPUT_SIZE, HIDDEN_SIZE, OUTPUT_SIZE)

    cat_ids = jax.random.randint(k_cat, (T, B), 0, N_CATEGORIES)
    inp_ids = jax.random.randint(k_inp, (T, B), 0, INPUT_SIZE)
    categories = jax.nn.one_hot(cat_ids, N_CATEGORIES, dtype=jnp.float32)
    inputs = jax.nn.one_hot(inp_ids, INPUT_SIZE, dtype=jnp.float32)
    hidden0 = jnp.zeros((B, HIDDEN_SIZE), jnp.float32)   # RNN.initHidden()

    # Whole sequence in one kernel launch (weights resident, hidden carried in VMEM,
    # time steps processed in blocks inside each grid iteration).
    out_seq, hidden_final = rnn_sequence_forward(categories, inputs, hidden0, params)
    jax.block_until_ready((out_seq, hidden_final))

    # Reference: the original single-step forward, looped in pure JAX.
    h = hidden0
    ref_outs = []
    for t in range(T):
        o, h = rnn_step_ref(categories[t], inputs[t], h, params)
        ref_outs.append(o)
    ref_out_seq = jnp.stack(ref_outs)

    assert out_seq.shape == (T, B, OUTPUT_SIZE)
    assert hidden_final.shape == (B, HIDDEN_SIZE)
    assert jnp.allclose(out_seq, ref_out_seq, atol=1e-5, rtol=1e-5), \
        float(jnp.max(jnp.abs(out_seq - ref_out_seq)))
    assert jnp.allclose(hidden_final, h, atol=1e-5, rtol=1e-5)

    # Also exercise a time-blocked case where TB < T (tail padding path).
    out_seq2, hidden_final2 = rnn_sequence_forward(
        categories, inputs, hidden0, params, time_block=4)
    jax.block_until_ready((out_seq2, hidden_final2))
    assert jnp.allclose(out_seq2, ref_out_seq, atol=1e-5, rtol=1e-5)
    assert jnp.allclose(hidden_final2, h, atol=1e-5, rtol=1e-5)

    # Single-step call exactly matching the module's forward(category, input, hidden).
    out1, hid1 = rnn_forward(categories[0], inputs[0], hidden0, params)
    jax.block_until_ready((out1, hid1))
    ref1, refh1 = rnn_step_ref(categories[0], inputs[0], hidden0, params)
    assert jnp.allclose(out1, ref1, atol=1e-5, rtol=1e-5)
    assert jnp.allclose(hid1, refh1, atol=1e-5, rtol=1e-5)

    print("KERNEL_OK")
</pallas_src>

<mosaic_0001>
module attributes {stable_mosaic.version = 11 : i64} {
  func.func @rnn_kernel(%arg0: i32, %arg1: memref<8x8x128xf32, #tpu.memory_space<vmem>>, %arg2: memref<8x128xf32, #tpu.memory_space<vmem>>, %arg3: memref<128x128xf32, #tpu.memory_space<vmem>>, %arg4: memref<128x128xf32, #tpu.memory_space<vmem>>, %arg5: memref<1x128xf32, #tpu.memory_space<vmem>>, %arg6: memref<128x128xf32, #tpu.memory_space<vmem>>, %arg7: memref<1x128xf32, #tpu.memory_space<vmem>>, %arg8: memref<8x8x128xf32, #tpu.memory_space<vmem>>, %arg9: memref<8x128xf32, #tpu.memory_space<vmem>>, %arg10: memref<8x128xf32, #tpu.memory_space<vmem>>) attributes {dimension_semantics = [#tpu.dimension_semantics<arbitrary>], iteration_bounds = array<i64: 1>, scalar_prefetch = 0 : i64, scratch_operands = 1 : i64, tpu.core_type = #tpu.core_type<tc>, window_params = [{transform_indices = @transform_0, window_bounds = array<i64: 8, 8, 128>}, {pipeline_mode = #tpu.pipeline_mode<synchronous>, transform_indices = @transform_1, window_bounds = array<i64: 8, 128>}, {pipeline_mode = #tpu.pipeline_mode<synchronous>, transform_indices = @transform_2, window_bounds = array<i64: 128, 128>}, {pipeline_mode = #tpu.pipeline_mode<synchronous>, transform_indices = @transform_3, window_bounds = array<i64: 128, 128>}, {pipeline_mode = #tpu.pipeline_mode<synchronous>, transform_indices = @transform_4, window_bounds = array<i64: 1, 128>}, {pipeline_mode = #tpu.pipeline_mode<synchronous>, transform_indices = @transform_5, window_bounds = array<i64: 128, 128>}, {pipeline_mode = #tpu.pipeline_mode<synchronous>, transform_indices = @transform_6, window_bounds = array<i64: 1, 128>}, {transform_indices = @transform_7, window_bounds = array<i64: 8, 8, 128>}, {pipeline_mode = #tpu.pipeline_mode<synchronous>, transform_indices = @transform_8, window_bounds = array<i64: 8, 128>}]} {
    %c0_i32 = arith.constant 0 : i32
    %0 = arith.cmpi eq, %arg0, %c0_i32 : i32
    %1 = arith.extui %0 : i1 to i32
    %c0_i32_0 = arith.constant 0 : i32
    %2 = arith.cmpi ne, %1, %c0_i32_0 : i32
    scf.if %2 {
      %c0_138 = arith.constant 0 : index
      %c0_139 = arith.constant 0 : index
      %252 = vector.load %arg2[%c0_138, %c0_139] : memref<8x128xf32, #tpu.memory_space<vmem>>, vector<8x128xf32>
      %c0_140 = arith.constant 0 : index
      %c0_141 = arith.constant 0 : index
      %253 = vector.load %arg10[%c0_140, %c0_141] : memref<8x128xf32, #tpu.memory_space<vmem>>, vector<8x128xf32>
      tpu.vector_store %arg10[%c0_140, %c0_141], %252 {strides = array<i32>} : memref<8x128xf32, #tpu.memory_space<vmem>>, vector<8x128xf32>,
    } else {
    }
    %c0 = arith.constant 0 : index
    %c0_1 = arith.constant 0 : index
    %3 = vector.load %arg3[%c0, %c0_1] : memref<128x128xf32, #tpu.memory_space<vmem>>, vector<128x128xf32>
    %c0_2 = arith.constant 0 : index
    %c0_3 = arith.constant 0 : index
    %4 = vector.load %arg4[%c0_2, %c0_3] : memref<128x128xf32, #tpu.memory_space<vmem>>, vector<128x128xf32>
    %c0_4 = arith.constant 0 : index
    %c0_5 = arith.constant 0 : index
    %5 = vector.load %arg6[%c0_4, %c0_5] : memref<128x128xf32, #tpu.memory_space<vmem>>, vector<128x128xf32>
    %c0_6 = arith.constant 0 : index
    %c0_7 = arith.constant 0 : index
    %6 = vector.load %arg5[%c0_6, %c0_7] : memref<1x128xf32, #tpu.memory_space<vmem>>, vector<1x128xf32>
    %7 = vector.shape_cast %6 : vector<1x128xf32> to vector<1x128xf32>
    %8 = vector.broadcast %7 : vector<1x128xf32> to vector<8x128xf32>
    %c0_8 = arith.constant 0 : index
    %c0_9 = arith.constant 0 : index
    %9 = vector.load %arg7[%c0_8, %c0_9] : memref<1x128xf32, #tpu.memory_space<vmem>>, vector<1x128xf32>
    %10 = vector.shape_cast %9 : vector<1x128xf32> to vector<1x128xf32>
    %11 = vector.broadcast %10 : vector<1x128xf32> to vector<8x128xf32>
    %c0_i32_10 = arith.constant 0 : i32
    %12 = arith.index_cast %c0_i32_10 : i32 to index
    %c0_11 = arith.constant 0 : index
    %c0_12 = arith.constant 0 : index
    %13 = vector.load %arg1[%12, %c0_11, %c0_12] : memref<8x8x128xf32, #tpu.memory_space<vmem>>, vector<1x8x128xf32>
    %14 = vector.shape_cast %13 : vector<1x8x128xf32> to vector<8x128xf32>
    %c0_13 = arith.constant 0 : index
    %c0_14 = arith.constant 0 : index
    %15 = vector.load %arg10[%c0_13, %c0_14] : memref<8x128xf32, #tpu.memory_space<vmem>>, vector<8x128xf32>
    %cst = arith.constant dense<0.000000e+00> : vector<8x128xf32>
    %16 = tpu.matmul %14, %3, %cst {dimension_numbers = #tpu.dot_dimension_numbers<[1], [0], [0], [1], [0, 0, 1, 1], [], []>} : vector<8x128xf32>, vector<128x128xf32>, vector<8x128xf32> -> vector<8x128xf32>
    %cst_15 = arith.constant dense<0.000000e+00> : vector<8x128xf32>
    %17 = tpu.matmul %15, %4, %cst_15 {dimension_numbers = #tpu.dot_dimension_numbers<[1], [0], [0], [1], [0, 0, 1, 1], [], []>} : vector<8x128xf32>, vector<128x128xf32>, vector<8x128xf32> -> vector<8x128xf32>
    %18 = arith.addf %16, %17 : vector<8x128xf32>
    %19 = arith.addf %18, %8 : vector<8x128xf32>
    %cst_16 = arith.constant dense<0.000000e+00> : vector<8x128xf32>
    %20 = tpu.matmul %19, %5, %cst_16 {dimension_numbers = #tpu.dot_dimension_numbers<[1], [0], [0], [1], [0, 0, 1, 1], [], []>} : vector<8x128xf32>, vector<128x128xf32>, vector<8x128xf32> -> vector<8x128xf32>
    %21 = arith.addf %20, %11 : vector<8x128xf32>
    %cst_17 = arith.constant dense<0xFF800000> : vector<8xf32>
    %22 = vector.multi_reduction <maximumf>, %21, %cst_17 [1] : vector<8x128xf32> to vector<8xf32>
    %23 = vector.shape_cast %22 : vector<8xf32> to vector<8x1xf32>
    %24 = vector.broadcast %23 : vector<8x1xf32> to vector<8x128xf32>
    %25 = arith.subf %21, %24 : vector<8x128xf32>
    %26 = math.exp %25 : vector<8x128xf32>
    %cst_18 = arith.constant dense<0.000000e+00> : vector<8xf32>
    %27 = vector.multi_reduction <add>, %26, %cst_18 [1] : vector<8x128xf32> to vector<8xf32>
    %28 = vector.shape_cast %27 : vector<8xf32> to vector<8x1xf32>
    %29 = math.log %28 : vector<8x1xf32>
    %30 = vector.broadcast %29 : vector<8x1xf32> to vector<8x128xf32>
    %31 = arith.subf %25, %30 : vector<8x128xf32>
    %32 = arith.index_cast %c0_i32_10 : i32 to index
    %c0_19 = arith.constant 0 : index
    %c0_20 = arith.constant 0 : index
    %33 = vector.load %arg8[%32, %c0_19, %c0_20] : memref<8x8x128xf32, #tpu.memory_space<vmem>>, vector<1x8x128xf32>
    %34 = vector.shape_cast %33 : vector<1x8x128xf32> to vector<8x128xf32>
    %35 = vector.shape_cast %31 : vector<8x128xf32> to vector<1x8x128xf32>
    tpu.vector_store %arg8[%32, %c0_19, %c0_20], %35 {strides = array<i32>} : memref<8x8x128xf32, #tpu.memory_space<vmem>>, vector<1x8x128xf32>,
    %c0_21 = arith.constant 0 : index
    %c0_22 = arith.constant 0 : index
    %36 = vector.load %arg10[%c0_21, %c0_22] : memref<8x128xf32, #tpu.memory_space<vmem>>, vector<8x128xf32>
    tpu.vector_store %arg10[%c0_21, %c0_22], %19 {strides = array<i32>} : memref<8x128xf32, #tpu.memory_space<vmem>>, vector<8x128xf32>,
    %c8_i32 = arith.constant 8 : i32
    %37 = arith.muli %arg0, %c8_i32 : i32
    %38 = arith.addi %37, %c0_i32_10 : i32
    %c7_i32 = arith.constant 7 : i32
    %39 = arith.cmpi eq, %38, %c7_i32 : i32
    %40 = arith.extui %39 : i1 to i32
    %c0_i32_23 = arith.constant 0 : i32
    %41 = arith.cmpi ne, %40, %c0_i32_23 : i32
    scf.if %41 {
      %c0_138 = arith.constant 0 : index
      %c0_139 = arith.constant 0 : index
      %252 = vector.load %arg9[%c0_138, %c0_139] : memref<8x128xf32, #tpu.memory_space<vmem>>, vector<8x128xf32>
      tpu.vector_store %arg9[%c0_138, %c0_139], %19 {strides = array<i32>} : memref<8x128xf32, #tpu.memory_space<vmem>>, vector<8x128xf32>,
    } else {
    }
    %c1_i32 = arith.constant 1 : i32
    %42 = arith.index_cast %c1_i32 : i32 to index
    %c0_24 = arith.constant 0 : index
    %c0_25 = arith.constant 0 : index
    %43 = vector.load %arg1[%42, %c0_24, %c0_25] : memref<8x8x128xf32, #tpu.memory_space<vmem>>, vector<1x8x128xf32>
    %44 = vector.shape_cast %43 : vector<1x8x128xf32> to vector<8x128xf32>
    %c0_26 = arith.constant 0 : index
    %c0_27 = arith.constant 0 : index
    %45 = vector.load %arg10[%c0_26, %c0_27] : memref<8x128xf32, #tpu.memory_space<vmem>>, vector<8x128xf32>
    %cst_28 = arith.constant dense<0.000000e+00> : vector<8x128xf32>
    %46 = tpu.matmul %44, %3, %cst_28 {dimension_numbers = #tpu.dot_dimension_numbers<[1], [0], [0], [1], [0, 0, 1, 1], [], []>} : vector<8x128xf32>, vector<128x128xf32>, vector<8x128xf32> -> vector<8x128xf32>
    %cst_29 = arith.constant dense<0.000000e+00> : vector<8x128xf32>
    %47 = tpu.matmul %45, %4, %cst_29 {dimension_numbers = #tpu.dot_dimension_numbers<[1], [0], [0], [1], [0, 0, 1, 1], [], []>} : vector<8x128xf32>, vector<128x128xf32>, vector<8x128xf32> -> vector<8x128xf32>
    %48 = arith.addf %46, %47 : vector<8x128xf32>
    %49 = arith.addf %48, %8 : vector<8x128xf32>
    %cst_30 = arith.constant dense<0.000000e+00> : vector<8x128xf32>
    %50 = tpu.matmul %49, %5, %cst_30 {dimension_numbers = #tpu.dot_dimension_numbers<[1], [0], [0], [1], [0, 0, 1, 1], [], []>} : vector<8x128xf32>, vector<128x128xf32>, vector<8x128xf32> -> vector<8x128xf32>
    %51 = arith.addf %50, %11 : vector<8x128xf32>
    %cst_31 = arith.constant dense<0xFF800000> : vector<8xf32>
    %52 = vector.multi_reduction <maximumf>, %51, %cst_31 [1] : vector<8x128xf32> to vector<8xf32>
    %53 = vector.shape_cast %52 : vector<8xf32> to vector<8x1xf32>
    %54 = vector.broadcast %53 : vector<8x1xf32> to vector<8x128xf32>
    %55 = arith.subf %51, %54 : vector<8x128xf32>
    %56 = math.exp %55 : vector<8x128xf32>
    %cst_32 = arith.constant dense<0.000000e+00> : vector<8xf32>
    %57 = vector.multi_reduction <add>, %56, %cst_32 [1] : vector<8x128xf32> to vector<8xf32>
    %58 = vector.shape_cast %57 : vector<8xf32> to vector<8x1xf32>
    %59 = math.log %58 : vector<8x1xf32>
    %60 = vector.broadcast %59 : vector<8x1xf32> to vector<8x128xf32>
    %61 = arith.subf %55, %60 : vector<8x128xf32>
    %62 = arith.index_cast %c1_i32 : i32 to index
    %c0_33 = arith.constant 0 : index
    %c0_34 = arith.constant 0 : index
    %63 = vector.load %arg8[%62, %c0_33, %c0_34] : memref<8x8x128xf32, #tpu.memory_space<vmem>>, vector<1x8x128xf32>
    %64 = vector.shape_cast %63 : vector<1x8x128xf32> to vector<8x128xf32>
    %65 = vector.shape_cast %61 : vector<8x128xf32> to vector<1x8x128xf32>
    tpu.vector_store %arg8[%62, %c0_33, %c0_34], %65 {strides = array<i32>} : memref<8x8x128xf32, #tpu.memory_space<vmem>>, vector<1x8x128xf32>,
    %c0_35 = arith.constant 0 : index
    %c0_36 = arith.constant 0 : index
    %66 = vector.load %arg10[%c0_35, %c0_36] : memref<8x128xf32, #tpu.memory_space<vmem>>, vector<8x128xf32>
    tpu.vector_store %arg10[%c0_35, %c0_36], %49 {strides = array<i32>} : memref<8x128xf32, #tpu.memory_space<vmem>>, vector<8x128xf32>,
    %c8_i32_37 = arith.constant 8 : i32
    %67 = arith.muli %arg0, %c8_i32_37 : i32
    %68 = arith.addi %67, %c1_i32 : i32
    %c7_i32_38 = arith.constant 7 : i32
    %69 = arith.cmpi eq, %68, %c7_i32_38 : i32
    %70 = arith.extui %69 : i1 to i32
    %c0_i32_39 = arith.constant 0 : i32
    %71 = arith.cmpi ne, %70, %c0_i32_39 : i32
    scf.if %71 {
      %c0_138 = arith.constant 0 : index
      %c0_139 = arith.constant 0 : index
      %252 = vector.load %arg9[%c0_138, %c0_139] : memref<8x128xf32, #tpu.memory_space<vmem>>, vector<8x128xf32>
      tpu.vector_store %arg9[%c0_138, %c0_139], %49 {strides = array<i32>} : memref<8x128xf32, #tpu.memory_space<vmem>>, vector<8x128xf32>,
    } else {
    }
    %c2_i32 = arith.constant 2 : i32
    %72 = arith.index_cast %c2_i32 : i32 to index
    %c0_40 = arith.constant 0 : index
    %c0_41 = arith.constant 0 : index
    %73 = vector.load %arg1[%72, %c0_40, %c0_41] : memref<8x8x128xf32, #tpu.memory_space<vmem>>, vector<1x8x128xf32>
    %74 = vector.shape_cast %73 : vector<1x8x128xf32> to vector<8x128xf32>
    %c0_42 = arith.constant 0 : index
    %c0_43 = arith.constant 0 : index
    %75 = vector.load %arg10[%c0_42, %c0_43] : memref<8x128xf32, #tpu.memory_space<vmem>>, vector<8x128xf32>
    %cst_44 = arith.constant dense<0.000000e+00> : vector<8x128xf32>
    %76 = tpu.matmul %74, %3, %cst_44 {dimension_numbers = #tpu.dot_dimension_numbers<[1], [0], [0], [1], [0, 0, 1, 1], [], []>} : vector<8x128xf32>, vector<128x128xf32>, vector<8x128xf32> -> vector<8x128xf32>
    %cst_45 = arith.constant dense<0.000000e+00> : vector<8x128xf32>
    %77 = tpu.matmul %75, %4, %cst_45 {dimension_numbers = #tpu.dot_dimension_numbers<[1], [0], [0], [1], [0, 0, 1, 1], [], []>} : vector<8x128xf32>, vector<128x128xf32>, vector<8x128xf32> -> vector<8x128xf32>
    %78 = arith.addf %76, %77 : vector<8x128xf32>
    %79 = arith.addf %78, %8 : vector<8x128xf32>
    %cst_46 = arith.constant dense<0.000000e+00> : vector<8x128xf32>
    %80 = tpu.matmul %79, %5, %cst_46 {dimension_numbers = #tpu.dot_dimension_numbers<[1], [0], [0], [1], [0, 0, 1, 1], [], []>} : vector<8x128xf32>, vector<128x128xf32>, vector<8x128xf32> -> vector<8x128xf32>
    %81 = arith.addf %80, %11 : vector<8x128xf32>
    %cst_47 = arith.constant dense<0xFF800000> : vector<8xf32>
    %82 = vector.multi_reduction <maximumf>, %81, %cst_47 [1] : vector<8x128xf32> to vector<8xf32>
    %83 = vector.shape_cast %82 : vector<8xf32> to vector<8x1xf32>
    %84 = vector.broadcast %83 : vector<8x1xf32> to vector<8x128xf32>
    %85 = arith.subf %81, %84 : vector<8x128xf32>
    %86 = math.exp %85 : vector<8x128xf32>
    %cst_48 = arith.constant dense<0.000000e+00> : vector<8xf32>
    %87 = vector.multi_reduction <add>, %86, %cst_48 [1] : vector<8x128xf32> to vector<8xf32>
    %88 = vector.shape_cast %87 : vector<8xf32> to vector<8x1xf32>
    %89 = math.log %88 : vector<8x1xf32>
    %90 = vector.broadcast %89 : vector<8x1xf32> to vector<8x128xf32>
    %91 = arith.subf %85, %90 : vector<8x128xf32>
    %92 = arith.index_cast %c2_i32 : i32 to index
    %c0_49 = arith.constant 0 : index
    %c0_50 = arith.constant 0 : index
    %93 = vector.load %arg8[%92, %c0_49, %c0_50] : memref<8x8x128xf32, #tpu.memory_space<vmem>>, vector<1x8x128xf32>
    %94 = vector.shape_cast %93 : vector<1x8x128xf32> to vector<8x128xf32>
    %95 = vector.shape_cast %91 : vector<8x128xf32> to vector<1x8x128xf32>
    tpu.vector_store %arg8[%92, %c0_49, %c0_50], %95 {strides = array<i32>} : memref<8x8x128xf32, #tpu.memory_space<vmem>>, vector<1x8x128xf32>,
    %c0_51 = arith.constant 0 : index
    %c0_52 = arith.constant 0 : index
    %96 = vector.load %arg10[%c0_51, %c0_52] : memref<8x128xf32, #tpu.memory_space<vmem>>, vector<8x128xf32>
    tpu.vector_store %arg10[%c0_51, %c0_52], %79 {strides = array<i32>} : memref<8x128xf32, #tpu.memory_space<vmem>>, vector<8x128xf32>,
    %c8_i32_53 = arith.constant 8 : i32
    %97 = arith.muli %arg0, %c8_i32_53 : i32
    %98 = arith.addi %97, %c2_i32 : i32
    %c7_i32_54 = arith.constant 7 : i32
    %99 = arith.cmpi eq, %98, %c7_i32_54 : i32
    %100 = arith.extui %99 : i1 to i32
    %c0_i32_55 = arith.constant 0 : i32
    %101 = arith.cmpi ne, %100, %c0_i32_55 : i32
    scf.if %101 {
      %c0_138 = arith.constant 0 : index
      %c0_139 = arith.constant 0 : index
      %252 = vector.load %arg9[%c0_138, %c0_139] : memref<8x128xf32, #tpu.memory_space<vmem>>, vector<8x128xf32>
      tpu.vector_store %arg9[%c0_138, %c0_139], %79 {strides = array<i32>} : memref<8x128xf32, #tpu.memory_space<vmem>>, vector<8x128xf32>,
    } else {
    }
    %c3_i32 = arith.constant 3 : i32
    %102 = arith.index_cast %c3_i32 : i32 to index
    %c0_56 = arith.constant 0 : index
    %c0_57 = arith.constant 0 : index
    %103 = vector.load %arg1[%102, %c0_56, %c0_57] : memref<8x8x128xf32, #tpu.memory_space<vmem>>, vector<1x8x128xf32>
    %104 = vector.shape_cast %103 : vector<1x8x128xf32> to vector<8x128xf32>
    %c0_58 = arith.constant 0 : index
    %c0_59 = arith.constant 0 : index
    %105 = vector.load %arg10[%c0_58, %c0_59] : memref<8x128xf32, #tpu.memory_space<vmem>>, vector<8x128xf32>
    %cst_60 = arith.constant dense<0.000000e+00> : vector<8x128xf32>
    %106 = tpu.matmul %104, %3, %cst_60 {dimension_numbers = #tpu.dot_dimension_numbers<[1], [0], [0], [1], [0, 0, 1, 1], [], []>} : vector<8x128xf32>, vector<128x128xf32>, vector<8x128xf32> -> vector<8x128xf32>
    %cst_61 = arith.constant dense<0.000000e+00> : vector<8x128xf32>
    %107 = tpu.matmul %105, %4, %cst_61 {dimension_numbers = #tpu.dot_dimension_numbers<[1], [0], [0], [1], [0, 0, 1, 1], [], []>} : vector<8x128xf32>, vector<128x128xf32>, vector<8x128xf32> -> vector<8x128xf32>
    %108 = arith.addf %106, %107 : vector<8x128xf32>
    %109 = arith.addf %108, %8 : vector<8x128xf32>
    %cst_62 = arith.constant dense<0.000000e+00> : vector<8x128xf32>
    %110 = tpu.matmul %109, %5, %cst_62 {dimension_numbers = #tpu.dot_dimension_numbers<[1], [0], [0], [1], [0, 0, 1, 1], [], []>} : vector<8x128xf32>, vector<128x128xf32>, vector<8x128xf32> -> vector<8x128xf32>
    %111 = arith.addf %110, %11 : vector<8x128xf32>
    %cst_63 = arith.constant dense<0xFF800000> : vector<8xf32>
    %112 = vector.multi_reduction <maximumf>, %111, %cst_63 [1] : vector<8x128xf32> to vector<8xf32>
    %113 = vector.shape_cast %112 : vector<8xf32> to vector<8x1xf32>
    %114 = vector.broadcast %113 : vector<8x1xf32> to vector<8x128xf32>
    %115 = arith.subf %111, %114 : vector<8x128xf32>
    %116 = math.exp %115 : vector<8x128xf32>
    %cst_64 = arith.constant dense<0.000000e+00> : vector<8xf32>
    %117 = vector.multi_reduction <add>, %116, %cst_64 [1] : vector<8x128xf32> to vector<8xf32>
    %118 = vector.shape_cast %117 : vector<8xf32> to vector<8x1xf32>
    %119 = math.log %118 : vector<8x1xf32>
    %120 = vector.broadcast %119 : vector<8x1xf32> to vector<8x128xf32>
    %121 = arith.subf %115, %120 : vector<8x128xf32>
    %122 = arith.index_cast %c3_i32 : i32 to index
    %c0_65 = arith.constant 0 : index
    %c0_66 = arith.constant 0 : index
    %123 = vector.load %arg8[%122, %c0_65, %c0_66] : memref<8x8x128xf32, #tpu.memory_space<vmem>>, vector<1x8x128xf32>
    %124 = vector.shape_cast %123 : vector<1x8x128xf32> to vector<8x128xf32>
    %125 = vector.shape_cast %121 : vector<8x128xf32> to vector<1x8x128xf32>
    tpu.vector_store %arg8[%122, %c0_65, %c0_66], %125 {strides = array<i32>} : memref<8x8x128xf32, #tpu.memory_space<vmem>>, vector<1x8x128xf32>,
    %c0_67 = arith.constant 0 : index
    %c0_68 = arith.constant 0 : index
    %126 = vector.load %arg10[%c0_67, %c0_68] : memref<8x128xf32, #tpu.memory_space<vmem>>, vector<8x128xf32>
    tpu.vector_store %arg10[%c0_67, %c0_68], %109 {strides = array<i32>} : memref<8x128xf32, #tpu.memory_space<vmem>>, vector<8x128xf32>,
    %c8_i32_69 = arith.constant 8 : i32
    %127 = arith.muli %arg0, %c8_i32_69 : i32
    %128 = arith.addi %127, %c3_i32 : i32
    %c7_i32_70 = arith.constant 7 : i32
    %129 = arith.cmpi eq, %128, %c7_i32_70 : i32
    %130 = arith.extui %129 : i1 to i32
    %c0_i32_71 = arith.constant 0 : i32
    %131 = arith.cmpi ne, %130, %c0_i32_71 : i32
    scf.if %131 {
      %c0_138 = arith.constant 0 : index
      %c0_139 = arith.constant 0 : index
      %252 = vector.load %arg9[%c0_138, %c0_139] : memref<8x128xf32, #tpu.memory_space<vmem>>, vector<8x128xf32>
      tpu.vector_store %arg9[%c0_138, %c0_139], %109 {strides = array<i32>} : memref<8x128xf32, #tpu.memory_space<vmem>>, vector<8x128xf32>,
    } else {
    }
    %c4_i32 = arith.constant 4 : i32
    %132 = arith.index_cast %c4_i32 : i32 to index
    %c0_72 = arith.constant 0 : index
    %c0_73 = arith.constant 0 : index
    %133 = vector.load %arg1[%132, %c0_72, %c0_73] : memref<8x8x128xf32, #tpu.memory_space<vmem>>, vector<1x8x128xf32>
    %134 = vector.shape_cast %133 : vector<1x8x128xf32> to vector<8x128xf32>
    %c0_74 = arith.constant 0 : index
    %c0_75 = arith.constant 0 : index
    %135 = vector.load %arg10[%c0_74, %c0_75] : memref<8x128xf32, #tpu.memory_space<vmem>>, vector<8x128xf32>
    %cst_76 = arith.constant dense<0.000000e+00> : vector<8x128xf32>
    %136 = tpu.matmul %134, %3, %cst_76 {dimension_numbers = #tpu.dot_dimension_numbers<[1], [0], [0], [1], [0, 0, 1, 1], [], []>} : vector<8x128xf32>, vector<128x128xf32>, vector<8x128xf32> -> vector<8x128xf32>
    %cst_77 = arith.constant dense<0.000000e+00> : vector<8x128xf32>
    %137 = tpu.matmul %135, %4, %cst_77 {dimension_numbers = #tpu.dot_dimension_numbers<[1], [0], [0], [1], [0, 0, 1, 1], [], []>} : vector<8x128xf32>, vector<128x128xf32>, vector<8x128xf32> -> vector<8x128xf32>
    %138 = arith.addf %136, %137 : vector<8x128xf32>
    %139 = arith.addf %138, %8 : vector<8x128xf32>
    %cst_78 = arith.constant dense<0.000000e+00> : vector<8x128xf32>
    %140 = tpu.matmul %139, %5, %cst_78 {dimension_numbers = #tpu.dot_dimension_numbers<[1], [0], [0], [1], [0, 0, 1, 1], [], []>} : vector<8x128xf32>, vector<128x128xf32>, vector<8x128xf32> -> vector<8x128xf32>
    %141 = arith.addf %140, %11 : vector<8x128xf32>
    %cst_79 = arith.constant dense<0xFF800000> : vector<8xf32>
    %142 = vector.multi_reduction <maximumf>, %141, %cst_79 [1] : vector<8x128xf32> to vector<8xf32>
    %143 = vector.shape_cast %142 : vector<8xf32> to vector<8x1xf32>
    %144 = vector.broadcast %143 : vector<8x1xf32> to vector<8x128xf32>
    %145 = arith.subf %141, %144 : vector<8x128xf32>
    %146 = math.exp %145 : vector<8x128xf32>
    %cst_80 = arith.constant dense<0.000000e+00> : vector<8xf32>
    %147 = vector.multi_reduction <add>, %146, %cst_80 [1] : vector<8x128xf32> to vector<8xf32>
    %148 = vector.shape_cast %147 : vector<8xf32> to vector<8x1xf32>
    %149 = math.log %148 : vector<8x1xf32>
    %150 = vector.broadcast %149 : vector<8x1xf32> to vector<8x128xf32>
    %151 = arith.subf %145, %150 : vector<8x128xf32>
    %152 = arith.index_cast %c4_i32 : i32 to index
    %c0_81 = arith.constant 0 : index
    %c0_82 = arith.constant 0 : index
    %153 = vector.load %arg8[%152, %c0_81, %c0_82] : memref<8x8x128xf32, #tpu.memory_space<vmem>>, vector<1x8x128xf32>
    %154 = vector.shape_cast %153 : vector<1x8x128xf32> to vector<8x128xf32>
    %155 = vector.shape_cast %151 : vector<8x128xf32> to vector<1x8x128xf32>
    tpu.vector_store %arg8[%152, %c0_81, %c0_82], %155 {strides = array<i32>} : memref<8x8x128xf32, #tpu.memory_space<vmem>>, vector<1x8x128xf32>,
    %c0_83 = arith.constant 0 : index
    %c0_84 = arith.constant 0 : index
    %156 = vector.load %arg10[%c0_83, %c0_84] : memref<8x128xf32, #tpu.memory_space<vmem>>, vector<8x128xf32>
    tpu.vector_store %arg10[%c0_83, %c0_84], %139 {strides = array<i32>} : memref<8x128xf32, #tpu.memory_space<vmem>>, vector<8x128xf32>,
    %c8_i32_85 = arith.constant 8 : i32
    %157 = arith.muli %arg0, %c8_i32_85 : i32
    %158 = arith.addi %157, %c4_i32 : i32
    %c7_i32_86 = arith.constant 7 : i32
    %159 = arith.cmpi eq, %158, %c7_i32_86 : i32
    %160 = arith.extui %159 : i1 to i32
    %c0_i32_87 = arith.constant 0 : i32
    %161 = arith.cmpi ne, %160, %c0_i32_87 : i32
    scf.if %161 {
      %c0_138 = arith.constant 0 : index
      %c0_139 = arith.constant 0 : index
      %252 = vector.load %arg9[%c0_138, %c0_139] : memref<8x128xf32, #tpu.memory_space<vmem>>, vector<8x128xf32>
      tpu.vector_store %arg9[%c0_138, %c0_139], %139 {strides = array<i32>} : memref<8x128xf32, #tpu.memory_space<vmem>>, vector<8x128xf32>,
    } else {
    }
    %c5_i32 = arith.constant 5 : i32
    %162 = arith.index_cast %c5_i32 : i32 to index
    %c0_88 = arith.constant 0 : index
    %c0_89 = arith.constant 0 : index
    %163 = vector.load %arg1[%162, %c0_88, %c0_89] : memref<8x8x128xf32, #tpu.memory_space<vmem>>, vector<1x8x128xf32>
    %164 = vector.shape_cast %163 : vector<1x8x128xf32> to vector<8x128xf32>
    %c0_90 = arith.constant 0 : index
    %c0_91 = arith.constant 0 : index
    %165 = vector.load %arg10[%c0_90, %c0_91] : memref<8x128xf32, #tpu.memory_space<vmem>>, vector<8x128xf32>
    %cst_92 = arith.constant dense<0.000000e+00> : vector<8x128xf32>
    %166 = tpu.matmul %164, %3, %cst_92 {dimension_numbers = #tpu.dot_dimension_numbers<[1], [0], [0], [1], [0, 0, 1, 1], [], []>} : vector<8x128xf32>, vector<128x128xf32>, vector<8x128xf32> -> vector<8x128xf32>
    %cst_93 = arith.constant dense<0.000000e+00> : vector<8x128xf32>
    %167 = tpu.matmul %165, %4, %cst_93 {dimension_numbers = #tpu.dot_dimension_numbers<[1], [0], [0], [1], [0, 0, 1, 1], [], []>} : vector<8x128xf32>, vector<128x128xf32>, vector<8x128xf32> -> vector<8x128xf32>
    %168 = arith.addf %166, %167 : vector<8x128xf32>
    %169 = arith.addf %168, %8 : vector<8x128xf32>
    %cst_94 = arith.constant dense<0.000000e+00> : vector<8x128xf32>
    %170 = tpu.matmul %169, %5, %cst_94 {dimension_numbers = #tpu.dot_dimension_numbers<[1], [0], [0], [1], [0, 0, 1, 1], [], []>} : vector<8x128xf32>, vector<128x128xf32>, vector<8x128xf32> -> vector<8x128xf32>
    %171 = arith.addf %170, %11 : vector<8x128xf32>
    %cst_95 = arith.constant dense<0xFF800000> : vector<8xf32>
    %172 = vector.multi_reduction <maximumf>, %171, %cst_95 [1] : vector<8x128xf32> to vector<8xf32>
    %173 = vector.shape_cast %172 : vector<8xf32> to vector<8x1xf32>
    %174 = vector.broadcast %173 : vector<8x1xf32> to vector<8x128xf32>
    %175 = arith.subf %171, %174 : vector<8x128xf32>
    %176 = math.exp %175 : vector<8x128xf32>
    %cst_96 = arith.constant dense<0.000000e+00> : vector<8xf32>
    %177 = vector.multi_reduction <add>, %176, %cst_96 [1] : vector<8x128xf32> to vector<8xf32>
    %178 = vector.shape_cast %177 : vector<8xf32> to vector<8x1xf32>
    %179 = math.log %178 : vector<8x1xf32>
    %180 = vector.broadcast %179 : vector<8x1xf32> to vector<8x128xf32>
    %181 = arith.subf %175, %180 : vector<8x128xf32>
    %182 = arith.index_cast %c5_i32 : i32 to index
    %c0_97 = arith.constant 0 : index
    %c0_98 = arith.constant 0 : index
    %183 = vector.load %arg8[%182, %c0_97, %c0_98] : memref<8x8x128xf32, #tpu.memory_space<vmem>>, vector<1x8x128xf32>
    %184 = vector.shape_cast %183 : vector<1x8x128xf32> to vector<8x128xf32>
    %185 = vector.shape_cast %181 : vector<8x128xf32> to vector<1x8x128xf32>
    tpu.vector_store %arg8[%182, %c0_97, %c0_98], %185 {strides = array<i32>} : memref<8x8x128xf32, #tpu.memory_space<vmem>>, vector<1x8x128xf32>,
    %c0_99 = arith.constant 0 : index
    %c0_100 = arith.constant 0 : index
    %186 = vector.load %arg10[%c0_99, %c0_100] : memref<8x128xf32, #tpu.memory_space<vmem>>, vector<8x128xf32>
    tpu.vector_store %arg10[%c0_99, %c0_100], %169 {strides = array<i32>} : memref<8x128xf32, #tpu.memory_space<vmem>>, vector<8x128xf32>,
    %c8_i32_101 = arith.constant 8 : i32
    %187 = arith.muli %arg0, %c8_i32_101 : i32
    %188 = arith.addi %187, %c5_i32 : i32
    %c7_i32_102 = arith.constant 7 : i32
    %189 = arith.cmpi eq, %188, %c7_i32_102 : i32
    %190 = arith.extui %189 : i1 to i32
    %c0_i32_103 = arith.constant 0 : i32
    %191 = arith.cmpi ne, %190, %c0_i32_103 : i32
    scf.if %191 {
      %c0_138 = arith.constant 0 : index
      %c0_139 = arith.constant 0 : index
      %252 = vector.load %arg9[%c0_138, %c0_139] : memref<8x128xf32, #tpu.memory_space<vmem>>, vector<8x128xf32>
      tpu.vector_store %arg9[%c0_138, %c0_139], %169 {strides = array<i32>} : memref<8x128xf32, #tpu.memory_space<vmem>>, vector<8x128xf32>,
    } else {
    }
    %c6_i32 = arith.constant 6 : i32
    %192 = arith.index_cast %c6_i32 : i32 to index
    %c0_104 = arith.constant 0 : index
    %c0_105 = arith.constant 0 : index
    %193 = vector.load %arg1[%192, %c0_104, %c0_105] : memref<8x8x128xf32, #tpu.memory_space<vmem>>, vector<1x8x128xf32>
    %194 = vector.shape_cast %193 : vector<1x8x128xf32> to vector<8x128xf32>
    %c0_106 = arith.constant 0 : index
    %c0_107 = arith.constant 0 : index
    %195 = vector.load %arg10[%c0_106, %c0_107] : memref<8x128xf32, #tpu.memory_space<vmem>>, vector<8x128xf32>
    %cst_108 = arith.constant dense<0.000000e+00> : vector<8x128xf32>
    %196 = tpu.matmul %194, %3, %cst_108 {dimension_numbers = #tpu.dot_dimension_numbers<[1], [0], [0], [1], [0, 0, 1, 1], [], []>} : vector<8x128xf32>, vector<128x128xf32>, vector<8x128xf32> -> vector<8x128xf32>
    %cst_109 = arith.constant dense<0.000000e+00> : vector<8x128xf32>
    %197 = tpu.matmul %195, %4, %cst_109 {dimension_numbers = #tpu.dot_dimension_numbers<[1], [0], [0], [1], [0, 0, 1, 1], [], []>} : vector<8x128xf32>, vector<128x128xf32>, vector<8x128xf32> -> vector<8x128xf32>
    %198 = arith.addf %196, %197 : vector<8x128xf32>
    %199 = arith.addf %198, %8 : vector<8x128xf32>
    %cst_110 = arith.constant dense<0.000000e+00> : vector<8x128xf32>
    %200 = tpu.matmul %199, %5, %cst_110 {dimension_numbers = #tpu.dot_dimension_numbers<[1], [0], [0], [1], [0, 0, 1, 1], [], []>} : vector<8x128xf32>, vector<128x128xf32>, vector<8x128xf32> -> vector<8x128xf32>
    %201 = arith.addf %200, %11 : vector<8x128xf32>
    %cst_111 = arith.constant dense<0xFF800000> : vector<8xf32>
    %202 = vector.multi_reduction <maximumf>, %201, %cst_111 [1] : vector<8x128xf32> to vector<8xf32>
    %203 = vector.shape_cast %202 : vector<8xf32> to vector<8x1xf32>
    %204 = vector.broadcast %203 : vector<8x1xf32> to vector<8x128xf32>
    %205 = arith.subf %201, %204 : vector<8x128xf32>
    %206 = math.exp %205 : vector<8x128xf32>
    %cst_112 = arith.constant dense<0.000000e+00> : vector<8xf32>
    %207 = vector.multi_reduction <add>, %206, %cst_112 [1] : vector<8x128xf32> to vector<8xf32>
    %208 = vector.shape_cast %207 : vector<8xf32> to vector<8x1xf32>
    %209 = math.log %208 : vector<8x1xf32>
    %210 = vector.broadcast %209 : vector<8x1xf32> to vector<8x128xf32>
    %211 = arith.subf %205, %210 : vector<8x128xf32>
    %212 = arith.index_cast %c6_i32 : i32 to index
    %c0_113 = arith.constant 0 : index
    %c0_114 = arith.constant 0 : index
    %213 = vector.load %arg8[%212, %c0_113, %c0_114] : memref<8x8x128xf32, #tpu.memory_space<vmem>>, vector<1x8x128xf32>
    %214 = vector.shape_cast %213 : vector<1x8x128xf32> to vector<8x128xf32>
    %215 = vector.shape_cast %211 : vector<8x128xf32> to vector<1x8x128xf32>
    tpu.vector_store %arg8[%212, %c0_113, %c0_114], %215 {strides = array<i32>} : memref<8x8x128xf32, #tpu.memory_space<vmem>>, vector<1x8x128xf32>,
    %c0_115 = arith.constant 0 : index
    %c0_116 = arith.constant 0 : index
    %216 = vector.load %arg10[%c0_115, %c0_116] : memref<8x128xf32, #tpu.memory_space<vmem>>, vector<8x128xf32>
    tpu.vector_store %arg10[%c0_115, %c0_116], %199 {strides = array<i32>} : memref<8x128xf32, #tpu.memory_space<vmem>>, vector<8x128xf32>,
    %c8_i32_117 = arith.constant 8 : i32
    %217 = arith.muli %arg0, %c8_i32_117 : i32
    %218 = arith.addi %217, %c6_i32 : i32
    %c7_i32_118 = arith.constant 7 : i32
    %219 = arith.cmpi eq, %218, %c7_i32_118 : i32
    %220 = arith.extui %219 : i1 to i32
    %c0_i32_119 = arith.constant 0 : i32
    %221 = arith.cmpi ne, %220, %c0_i32_119 : i32
    scf.if %221 {
      %c0_138 = arith.constant 0 : index
      %c0_139 = arith.constant 0 : index
      %252 = vector.load %arg9[%c0_138, %c0_139] : memref<8x128xf32, #tpu.memory_space<vmem>>, vector<8x128xf32>
      tpu.vector_store %arg9[%c0_138, %c0_139], %199 {strides = array<i32>} : memref<8x128xf32, #tpu.memory_space<vmem>>, vector<8x128xf32>,
    } else {
    }
    %c7_i32_120 = arith.constant 7 : i32
    %222 = arith.index_cast %c7_i32_120 : i32 to index
    %c0_121 = arith.constant 0 : index
    %c0_122 = arith.constant 0 : index
    %223 = vector.load %arg1[%222, %c0_121, %c0_122] : memref<8x8x128xf32, #tpu.memory_space<vmem>>, vector<1x8x128xf32>
    %224 = vector.shape_cast %223 : vector<1x8x128xf32> to vector<8x128xf32>
    %c0_123 = arith.constant 0 : index
    %c0_124 = arith.constant 0 : index
    %225 = vector.load %arg10[%c0_123, %c0_124] : memref<8x128xf32, #tpu.memory_space<vmem>>, vector<8x128xf32>
    %cst_125 = arith.constant dense<0.000000e+00> : vector<8x128xf32>
    %226 = tpu.matmul %224, %3, %cst_125 {dimension_numbers = #tpu.dot_dimension_numbers<[1], [0], [0], [1], [0, 0, 1, 1], [], []>} : vector<8x128xf32>, vector<128x128xf32>, vector<8x128xf32> -> vector<8x128xf32>
    %cst_126 = arith.constant dense<0.000000e+00> : vector<8x128xf32>
    %227 = tpu.matmul %225, %4, %cst_126 {dimension_numbers = #tpu.dot_dimension_numbers<[1], [0], [0], [1], [0, 0, 1, 1], [], []>} : vector<8x128xf32>, vector<128x128xf32>, vector<8x128xf32> -> vector<8x128xf32>
    %228 = arith.addf %226, %227 : vector<8x128xf32>
    %229 = arith.addf %228, %8 : vector<8x128xf32>
    %cst_127 = arith.constant dense<0.000000e+00> : vector<8x128xf32>
    %230 = tpu.matmul %229, %5, %cst_127 {dimension_numbers = #tpu.dot_dimension_numbers<[1], [0], [0], [1], [0, 0, 1, 1], [], []>} : vector<8x128xf32>, vector<128x128xf32>, vector<8x128xf32> -> vector<8x128xf32>
    %231 = arith.addf %230, %11 : vector<8x128xf32>
    %cst_128 = arith.constant dense<0xFF800000> : vector<8xf32>
    %232 = vector.multi_reduction <maximumf>, %231, %cst_128 [1] : vector<8x128xf32> to vector<8xf32>
    %233 = vector.shape_cast %232 : vector<8xf32> to vector<8x1xf32>
    %234 = vector.broadcast %233 : vector<8x1xf32> to vector<8x128xf32>
    %235 = arith.subf %231, %234 : vector<8x128xf32>
    %236 = math.exp %235 : vector<8x128xf32>
    %cst_129 = arith.constant dense<0.000000e+00> : vector<8xf32>
    %237 = vector.multi_reduction <add>, %236, %cst_129 [1] : vector<8x128xf32> to vector<8xf32>
    %238 = vector.shape_cast %237 : vector<8xf32> to vector<8x1xf32>
    %239 = math.log %238 : vector<8x1xf32>
    %240 = vector.broadcast %239 : vector<8x1xf32> to vector<8x128xf32>
    %241 = arith.subf %235, %240 : vector<8x128xf32>
    %242 = arith.index_cast %c7_i32_120 : i32 to index
    %c0_130 = arith.constant 0 : index
    %c0_131 = arith.constant 0 : index
    %243 = vector.load %arg8[%242, %c0_130, %c0_131] : memref<8x8x128xf32, #tpu.memory_space<vmem>>, vector<1x8x128xf32>
    %244 = vector.shape_cast %243 : vector<1x8x128xf32> to vector<8x128xf32>
    %245 = vector.shape_cast %241 : vector<8x128xf32> to vector<1x8x128xf32>
    tpu.vector_store %arg8[%242, %c0_130, %c0_131], %245 {strides = array<i32>} : memref<8x8x128xf32, #tpu.memory_space<vmem>>, vector<1x8x128xf32>,
    %c0_132 = arith.constant 0 : index
    %c0_133 = arith.constant 0 : index
    %246 = vector.load %arg10[%c0_132, %c0_133] : memref<8x128xf32, #tpu.memory_space<vmem>>, vector<8x128xf32>
    tpu.vector_store %arg10[%c0_132, %c0_133], %229 {strides = array<i32>} : memref<8x128xf32, #tpu.memory_space<vmem>>, vector<8x128xf32>,
    %c8_i32_134 = arith.constant 8 : i32
    %247 = arith.muli %arg0, %c8_i32_134 : i32
    %248 = arith.addi %247, %c7_i32_120 : i32
    %c7_i32_135 = arith.constant 7 : i32
    %249 = arith.cmpi eq, %248, %c7_i32_135 : i32
    %250 = arith.extui %249 : i1 to i32
    %c0_i32_136 = arith.constant 0 : i32
    %251 = arith.cmpi ne, %250, %c0_i32_136 : i32
    scf.if %251 {
      %c0_138 = arith.constant 0 : index
      %c0_139 = arith.constant 0 : index
      %252 = vector.load %arg9[%c0_138, %c0_139] : memref<8x128xf32, #tpu.memory_space<vmem>>, vector<8x128xf32>
      tpu.vector_store %arg9[%c0_138, %c0_139], %229 {strides = array<i32>} : memref<8x128xf32, #tpu.memory_space<vmem>>, vector<8x128xf32>,
    } else {
    }
    %c8_i32_137 = arith.constant 8 : i32
    return
  }
  func.func @transform_0(%arg0: i32) -> (i32, i32, i32) {
    %c0_i32 = arith.constant 0 : i32
    %c0_i32_0 = arith.constant 0 : i32
    %c0_i32_1 = arith.constant 0 : i32
    return %arg0, %c0_i32, %c0_i32_0 : i32, i32, i32
  }
  func.func @transform_1(%arg0: i32) -> (i32, i32) {
    %c0_i32 = arith.constant 0 : i32
    %c0_i32_0 = arith.constant 0 : i32
    %c0_i32_1 = arith.constant 0 : i32
    return %c0_i32, %c0_i32_0 : i32, i32
  }
  func.func @transform_2(%arg0: i32) -> (i32, i32) {
    %c0_i32 = arith.constant 0 : i32
    %c0_i32_0 = arith.constant 0 : i32
    %c0_i32_1 = arith.constant 0 : i32
    return %c0_i32, %c0_i32_0 : i32, i32
  }
  func.func @transform_3(%arg0: i32) -> (i32, i32) {
    %c0_i32 = arith.constant 0 : i32
    %c0_i32_0 = arith.constant 0 : i32
    %c0_i32_1 = arith.constant 0 : i32
    return %c0_i32, %c0_i32_0 : i32, i32
  }
  func.func @transform_4(%arg0: i32) -> (i32, i32) {
    %c0_i32 = arith.constant 0 : i32
    %c0_i32_0 = arith.constant 0 : i32
    %c0_i32_1 = arith.constant 0 : i32
    return %c0_i32, %c0_i32_0 : i32, i32
  }
  func.func @transform_5(%arg0: i32) -> (i32, i32) {
    %c0_i32 = arith.constant 0 : i32
    %c0_i32_0 = arith.constant 0 : i32
    %c0_i32_1 = arith.constant 0 : i32
    return %c0_i32, %c0_i32_0 : i32, i32
  }
  func.func @transform_6(%arg0: i32) -> (i32, i32) {
    %c0_i32 = arith.constant 0 : i32
    %c0_i32_0 = arith.constant 0 : i32
    %c0_i32_1 = arith.constant 0 : i32
    return %c0_i32, %c0_i32_0 : i32, i32
  }
  func.func @transform_7(%arg0: i32) -> (i32, i32, i32) {
    %c0_i32 = arith.constant 0 : i32
    %c0_i32_0 = arith.constant 0 : i32
    %c0_i32_1 = arith.constant 0 : i32
    return %arg0, %c0_i32, %c0_i32_0 : i32, i32, i32
  }
  func.func @transform_8(%arg0: i32) -> (i32, i32) {
    %c0_i32 = arith.constant 0 : i32
    %c0_i32_0 = arith.constant 0 : i32
    %c0_i32_1 = arith.constant 0 : i32
    return %c0_i32, %c0_i32_0 : i32, i32
  }
}

</mosaic_0001>

<bundles_post_ra>
// kernel: tpu_custom_call.1
= control target key start
LH: loop header
LB: loop body
LE: loop exit
PB: predicated region body
PF: predicated region fallthrough
CT: control target
= control target key end

     0   :  { %14 = vsyncpa [#allocation4], 0  ;;  %s4779_s0 = inlined_call_operand.hbm [shape: f32[8,8,128], index: 0, kind: input, shape index: {}]   ;;  %s4780_s1 = inlined_call_operand.hbm [shape: f32[8,128], index: 1, kind: input, shape index: {}]   ;;  %s4781_s2 = inlined_call_operand.hbm [shape: f32[128,128], index: 2, kind: input, shape index: {}]   ;;  %s4782_s3 = inlined_call_operand.hbm [shape: f32[128,128], index: 3, kind: input, shape index: {}]   ;;  %s4783_s4 = inlined_call_operand.vmem [shape: f32[1,128], index: 4, kind: input, shape index: {}]   ;;  %s4784_s5 = inlined_call_operand.hbm [shape: f32[128,128], index: 5, kind: input, shape index: {}]   ;;  %s4785_s6 = inlined_call_operand.vmem [shape: f32[1,128], index: 6, kind: input, shape index: {}]   ;;  %s4786_s7 = inlined_call_operand.hbm [shape: f32[8,8,128], index: 7, kind: output, shape index: {0}]   ;;  %s4787_s8 = inlined_call_operand.hbm [shape: f32[8,128], index: 8, kind: output, shape index: {1}]  }
   0x1   :  { %15 = vsyncpa [#allocation7], 0 }
   0x2   :  { %16 = vsyncpa [#allocation10], 0 }
   0x3   :  { %17 = vsyncpa [#allocation5], 0 }
   0x4   :  { %18 = vsyncpa [#allocation14], 0  ;;  %s4093_s27 = smov [#allocation6]   ;;  %s3929_s9 = scalar_lea.hbm %s4780_s1, 128 }
   0x5   :  { %s37_s28 = sshll.u32 %s4093_s27, 4  ;;  %p3930_p0 = scmp.ne.s32.totalorder %s4780_s1, %s3929_s9  ;;  %s38_s28 = int_to_ptr.vmem [resolvable:$true] %s37_s28 }
   0x6   :  { %p3933_p1 = scmp.lt.u32.totalorder %s3929_s9, %s4780_s1 }
   0x8   :  { %p3935_p2 = pnand %p3933_p1, %p3930_p0 }
   0xa   :  { %3938 = shalt.err (!%p3935_p2)
}
   0xb   :  { %s3939_s14 = scalar_lea.vmem %s38_s28, 128  ;;  %p3944_p4 = scmp.lt.s32.totalorder %s38_s28, %s38_s28 }
   0xc   :  { %p3940_p3 = scmp.ne.s32.totalorder %s38_s28, %s3939_s14  ;;  %p3945_p5 = scmp.lt.s32.totalorder %s3939_s14, %s3939_s14 }
   0xe   :  { %p3946_p6 = por %p3945_p5, %p3944_p4 }
  0x10   :  { %p3947_p7 = pnand %p3946_p6, %p3940_p3 }
  0x12   :  { %3950 = shalt.err (!%p3947_p7)
}
  0x13   :  { %40 = dma.hbm_to_vmem [thread:$0]  %s4780_s1, 128, %s38_s28, [#allocation7]  }
  0x14   :  { %s4094_s17 = smov [#allocation9]   ;;  %s4095_s19 = smov [#allocation3]  }
  0x15   :  { %s58_s18 = sshll.u32 %s4094_s17, 4  ;;  %s24_s20 = sshll.u32 %s4095_s19, 4  ;;  %s59_s18 = int_to_ptr.vmem [resolvable:$true] %s58_s18  ;;  %s25_s20 = int_to_ptr.vmem [resolvable:$true] %s24_s20 }
  0x16   :  { %s3951_s23 = scalar_lea.hbm %s4782_s3, 2048 }
  0x17   :  { %p3952_p8 = scmp.ne.s32.totalorder %s4782_s3, %s3951_s23  ;;  %p3955_p9 = scmp.lt.u32.totalorder %s3951_s23, %s4782_s3 }
  0x19   :  { %p3957_p10 = pnand %p3955_p9, %p3952_p8 }
  0x1b   :  { %3960 = shalt.err (!%p3957_p10)
}
  0x1c   :  { %s3961_s1 = scalar_lea.vmem %s59_s18, 2048  ;;  %p3966_p12 = scmp.lt.s32.totalorder %s59_s18, %s59_s18 }
  0x1d   :  { %p3962_p11 = scmp.ne.s32.totalorder %s59_s18, %s3961_s1  ;;  %p3967_p13 = scmp.lt.s32.totalorder %s3961_s1, %s3961_s1 }
  0x1f   :  { %p3968_p0 = por %p3967_p13, %p3966_p12 }
  0x21   :  { %p3969_p1 = pnand %p3968_p0, %p3962_p11 }
  0x23   :  { %3972 = shalt.err (!%p3969_p1)
}
  0x24   :  { %s4096_s28 = smov 128   ;;  %s4097_s29 = smov 8  }
  0x25   :  { %64 = dma.hbm_to_vmem [thread:$0]  %s4782_s3, 2048, %s59_s18, [#allocation10], %s4096_s28, %s4096_s28, %s4097_s29  }
  0x26   :  { %s3973_s12 = scalar_lea.hbm %s4779_s0, 1024 }
  0x27   :  { %p3974_p2 = scmp.ne.s32.totalorder %s4779_s0, %s3973_s12  ;;  %p3977_p3 = scmp.lt.u32.totalorder %s3973_s12, %s4779_s0 }
  0x29   :  { %p3979_p4 = pnand %p3977_p3, %p3974_p2 }
  0x2b   :  { %3982 = shalt.err (!%p3979_p4)
}
  0x2c   :  { %s3983_s17 = scalar_lea.vmem %s25_s20, 1024  ;;  %p3988_p6 = scmp.lt.s32.totalorder %s25_s20, %s25_s20 }
  0x2d   :  { %p3984_p5 = scmp.ne.s32.totalorder %s25_s20, %s3983_s17  ;;  %p3989_p7 = scmp.lt.s32.totalorder %s3983_s17, %s3983_s17 }
  0x2f   :  { %p3990_p8 = por %p3989_p7, %p3988_p6 }
  0x31   :  { %p3991_p9 = pnand %p3990_p8, %p3984_p5 }
  0x33   :  { %3994 = shalt.err (!%p3991_p9)
}
  0x34   :  { %30 = dma.hbm_to_vmem [thread:$0]  %s4779_s0, 1024, %s25_s20, [#allocation4], %s4096_s28, %s4096_s28, %s4097_s29  }
  0x35   :  { %s4098_s19 = smov [#allocation8]   ;;  %s4099_s22 = smov [#allocation11]  }
  0x36   :  { %s46_s21 = sshll.u32 %s4098_s19, 4  ;;  %s72_s23 = sshll.u32 %s4099_s22, 4  ;;  %s47_s21 = int_to_ptr.vmem [resolvable:$true] %s46_s21  ;;  %s73_s23 = int_to_ptr.vmem [resolvable:$true] %s72_s23 }
  0x37   :  { %s3995_s26 = scalar_lea.hbm %s4781_s2, 2048 }
  0x38   :  { %p3996_p10 = scmp.ne.s32.totalorder %s4781_s2, %s3995_s26  ;;  %p3999_p11 = scmp.lt.u32.totalorder %s3995_s26, %s4781_s2 }
  0x3a   :  { %p4001_p12 = pnand %p3999_p11, %p3996_p10 }
  0x3c   :  { %4004 = shalt.err (!%p4001_p12)
}
  0x3d   :  { %s4005_s0 = scalar_lea.vmem %s47_s21, 2048  ;;  %p4010_p0 = scmp.lt.s32.totalorder %s47_s21, %s47_s21 }
  0x3e   :  { %p4006_p13 = scmp.ne.s32.totalorder %s47_s21, %s4005_s0  ;;  %p4011_p1 = scmp.lt.s32.totalorder %s4005_s0, %s4005_s0 }
  0x40   :  { %p4012_p2 = por %p4011_p1, %p4010_p0 }
  0x42   :  { %p4013_p3 = pnand %p4012_p2, %p4006_p13 }
  0x44   :  { %4016 = shalt.err (!%p4013_p3)
}
  0x45   :  { %52 = dma.hbm_to_vmem [thread:$0]  %s4781_s2, 2048, %s47_s21, [#allocation7], %s4096_s28, %s4096_s28, %s4097_s29  }
  0x46   :  { %s4017_s13 = scalar_lea.hbm %s4784_s5, 2048 }
  0x47   :  { %p4018_p4 = scmp.ne.s32.totalorder %s4784_s5, %s4017_s13  ;;  %p4021_p5 = scmp.lt.u32.totalorder %s4017_s13, %s4784_s5 }
  0x49   :  { %p4023_p6 = pnand %p4021_p5, %p4018_p4 }
  0x4b   :  { %4026 = shalt.err (!%p4023_p6)
}
  0x4c   :  { %s4027_s3 = scalar_lea.vmem %s73_s23, 2048  ;;  %p4032_p8 = scmp.lt.s32.totalorder %s73_s23, %s73_s23 }
  0x4d   :  { %p4028_p7 = scmp.ne.s32.totalorder %s73_s23, %s4027_s3  ;;  %p4033_p9 = scmp.lt.s32.totalorder %s4027_s3, %s4027_s3 }
  0x4f   :  { %p4034_p10 = por %p4033_p9, %p4032_p8 }
  0x51   :  { %p4035_p11 = pnand %p4034_p10, %p4028_p7 }
  0x53   :  { %4038 = shalt.err (!%p4035_p11)
}
  0x54   :  { %78 = dma.hbm_to_vmem [thread:$0]  %s4784_s5, 2048, %s73_s23, [#allocation10], %s4096_s28, %s4096_s28, %s4097_s29  }
  0x55   :  { %4083 = dma.done.wait [#allocation4], 1024  }
  0x56   :  { %4084 = vsyncadd [#allocation4], 4294966272 }
  0x57   :  { %4085 = dma.done.wait [#allocation7], 2176  }
  0x58   :  { %4086 = vsyncadd [#allocation7], 4294965120 }
  0x59   :  { %4087 = dma.done.wait [#allocation10], 4096  }
  0x5a   :  { %4088 = vsyncadd [#allocation10], 4294963200  ;;  %v4100_v0 = vmov 0.0|0.0   ;;  %vm4101_vm0 = vmmov 0   ;;  %v4102_v1 = vmov 0.0   ;;  %v118_v2 = vld [vmem:[#allocation9] sm:$0xff] }
  0x5b   :  { %3309 = vmatprep.subr.bf16.mxu0 %v4100_v0  ;;  %3333 = vmatprep.subr.bf16.mxu1 %v4100_v0  ;;  %v119_v3 = vld [vmem:[#allocation9 + $0x8] sm:$0xff]  ;;  %v102_v4 = vld [vmem:[#allocation8] sm:$0xff]  ;;  %v120_v7 = vld [vmem:[#allocation9 + $0x10] sm:$0xff] }
  0x5c   :  { %2501 = vmatprep.mubr.msk.f32.mxu0 %vm4101_vm0, %v4102_v1  ;;  %2536 = vmatprep.mubr.msk.f32.mxu1 %vm4101_vm0, %v4102_v1  ;;  %v4228_v5 = vpack.c.bf16 %v119_v3, %v118_v2  ;;  %v103_v6 = vld [vmem:[#allocation8 + $0x8] sm:$0xff]  ;;  %v121_v8 = vld [vmem:[#allocation9 + $0x18] sm:$0xff]  ;;  %v104_v10 = vld [vmem:[#allocation8 + $0x10] sm:$0xff] }
  0x5d   :  { %v4230_v9 = vpack.c.bf16 %v103_v6, %v102_v4  ;;  %v105_v11 = vld [vmem:[#allocation8 + $0x18] sm:$0xff]  ;;  %v4233_v12 = vpack.c.bf16 %v121_v8, %v120_v7  ;;  %v122_v14 = vld [vmem:[#allocation9 + $0x20] sm:$0xff]  ;;  %v123_v15 = vld [vmem:[#allocation9 + $0x28] sm:$0xff] }
  0x5e   :  { %3311 = vmatpush3.bf16.msra.mxu0 %v4228_v5  ;;  %v4237_v13 = vpack.c.bf16 %v105_v11, %v104_v10  ;;  %v106_v16 = vld [vmem:[#allocation8 + $0x20] sm:$0xff]  ;;  %v107_v17 = vld [vmem:[#allocation8 + $0x28] sm:$0xff]  ;;  %v4241_v18 = vpack.c.bf16 %v123_v15, %v122_v14  ;;  %v124_v20 = vld [vmem:[#allocation9 + $0x30] sm:$0xff] }
  0x5f   :  { %3335 = vmatpush3.bf16.msra.mxu1 %v4230_v9  ;;  %3312 = vmatprep.subr.bf16.mxu0 %v4100_v0  ;;  %v4245_v19 = vpack.c.bf16 %v107_v17, %v106_v16  ;;  %v125_v21 = vld [vmem:[#allocation9 + $0x38] sm:$0xff]  ;;  %v108_v22 = vld [vmem:[#allocation8 + $0x30] sm:$0xff]  ;;  %v126_v26 = vld [vmem:[#allocation9 + $0x40] sm:$0xff] }
  0x60   :  { %3336 = vmatprep.subr.bf16.mxu1 %v4100_v0  ;;  %v109_v23 = vld [vmem:[#allocation8 + $0x38] sm:$0xff]  ;;  %v4249_v24 = vpack.c.bf16 %v125_v21, %v124_v20  ;;  %v127_v27 = vld [vmem:[#allocation9 + $0x48] sm:$0xff]  ;;  %v110_v28 = vld [vmem:[#allocation8 + $0x40] sm:$0xff] }
  0x61   :  { %v4253_v25 = vpack.c.bf16 %v109_v23, %v108_v22  ;;  %v111_v29 = vld [vmem:[#allocation8 + $0x48] sm:$0xff]  ;;  %v4257_v30 = vpack.c.bf16 %v127_v27, %v126_v26  ;;  %v128_v32 = vld [vmem:[#allocation9 + $0x50] sm:$0xff]  ;;  %v129_v33 = vld [vmem:[#allocation9 + $0x58] sm:$0xff] }
  0x62   :  { %3314 = vmatpush3.bf16.msra.mxu0 %v4233_v12  ;;  %v4261_v31 = vpack.c.bf16 %v111_v29, %v110_v28  ;;  %v112_v34 = vld [vmem:[#allocation8 + $0x50] sm:$0xff]  ;;  %v113_v35 = vld [vmem:[#allocation8 + $0x58] sm:$0xff]  ;;  %v4265_v36 = vpack.c.bf16 %v129_v33, %v128_v32  ;;  %v130_v38 = vld [vmem:[#allocation9 + $0x60] sm:$0xff] }
  0x63   :  { %3338 = vmatpush3.bf16.msra.mxu1 %v4237_v13  ;;  %3315 = vmatprep.subr.bf16.mxu0 %v4100_v0  ;;  %v4269_v37 = vpack.c.bf16 %v113_v35, %v112_v34  ;;  %v131_v39 = vld [vmem:[#allocation9 + $0x68] sm:$0xff]  ;;  %v114_v40 = vld [vmem:[#allocation8 + $0x60] sm:$0xff]  ;;  %v132_v44 = vld [vmem:[#allocation9 + $0x70] sm:$0xff] }
  0x64   :  { %3339 = vmatprep.subr.bf16.mxu1 %v4100_v0  ;;  %v115_v41 = vld [vmem:[#allocation8 + $0x68] sm:$0xff]  ;;  %v4273_v42 = vpack.c.bf16 %v131_v39, %v130_v38  ;;  %v133_v45 = vld [vmem:[#allocation9 + $0x78] sm:$0xff]  ;;  %v116_v46 = vld [vmem:[#allocation8 + $0x70] sm:$0xff] }
  0x65   :  { %v4277_v43 = vpack.c.bf16 %v115_v41, %v114_v40  ;;  %v117_v47 = vld [vmem:[#allocation8 + $0x78] sm:$0xff]  ;;  %v4281_v48 = vpack.c.bf16 %v133_v45, %v132_v44  ;;  %v134_v50 = vld [vmem:[#allocation11] sm:$0xff]  ;;  %v135_v51 = vld [vmem:[#allocation11 + $0x8] sm:$0xff] }
  0x66   :  { %3317 = vmatpush3.bf16.msra.mxu0 %v4241_v18  ;;  %v4285_v49 = vpack.c.bf16 %v117_v47, %v116_v46  ;;  %v100_v52 = vld [vmem:[#allocation6] sm:$0xff]  ;;  %v4289_v53 = vpack.c.bf16 %v135_v51, %v134_v50  ;;  %v136_v55 = vld [vmem:[#allocation11 + $0x10] sm:$0xff]  ;;  %v138_v58 = vld [vmem:[#allocation11 + $0x20] sm:$0xff] }
  0x67   :  { %3341 = vmatpush3.bf16.msra.mxu1 %v4245_v19  ;;  %3318 = vmatprep.subr.bf16.mxu0 %v4100_v0  ;;  %v164_v54 = vld [vmem:[#allocation3] sm:$0xff]  ;;  %v139_v59 = vld [vmem:[#allocation11 + $0x28] sm:$0xff]  ;;  %v140_v61 = vld [vmem:[#allocation11 + $0x30] sm:$0xff] }
  0x68   :  { %3342 = vmatprep.subr.bf16.mxu1 %v4100_v0  ;;  %v137_v56 = vld [vmem:[#allocation11 + $0x18] sm:$0xff]  ;;  %v4305_v60 = vpack.c.bf16 %v139_v59, %v138_v58  ;;  %v142_v2 = vld [vmem:[#allocation11 + $0x40] sm:$0xff]  ;;  %v143_v3 = vld [vmem:[#allocation11 + $0x48] sm:$0xff] }
  0x69   :  { %v4295_v57 = vpack.c.bf16 %v137_v56, %v136_v55  ;;  %v141_v62 = vld [vmem:[#allocation11 + $0x38] sm:$0xff]  ;;  %v4317_v4 = vpack.c.bf16 %v143_v3, %v142_v2  ;;  %v144_v6 = vld [vmem:[#allocation11 + $0x50] sm:$0xff]  ;;  %v146_v10 = vld [vmem:[#allocation11 + $0x60] sm:$0xff] }
  0x6a   :  { %3320 = vmatpush3.bf16.msra.mxu0 %v4249_v24  ;;  %v4311_v63 = vpack.c.bf16 %v141_v62, %v140_v61  ;;  %v145_v7 = vld [vmem:[#allocation11 + $0x58] sm:$0xff]  ;;  %v147_v11 = vld [vmem:[#allocation11 + $0x68] sm:$0xff]  ;;  %v148_v15 = vld [vmem:[#allocation11 + $0x70] sm:$0xff] }
  0x6b   :  { %3344 = vmatpush3.bf16.msra.mxu1 %v4253_v25  ;;  %3321 = vmatprep.subr.bf16.mxu0 %v4100_v0  ;;  %v4323_v8 = vpack.c.bf16 %v145_v7, %v144_v6  ;;  %v4329_v14 = vpack.c.bf16 %v147_v11, %v146_v10  ;;  %v149_v16 = vld [vmem:[#allocation11 + $0x78] sm:$0xff]  ;;  %v396_v29 = vld [vmem:[#allocation3 + $0x8] sm:$0xff]  ;;  %v629_v46 = vld [vmem:[#allocation3 + $0x10] sm:$0xff] }
  0x6c   :  { %3345 = vmatprep.subr.bf16.mxu1 %v4100_v0  ;;  %v4340_v17 = vpack.c.bf16 %v149_v16, %v148_v15  ;;  %v4347_v21 = vld [vmem:[%s4783_s4] ss:$0 sm:$0xff]  ;;  %v862_v61 = vld [vmem:[#allocation3 + $0x18] sm:$0xff] }
  0x6d   :  { %v4407_v32 = vld [vmem:[%s4785_s6] ss:$0 sm:$0xff]  ;;  %s4103_s6 = smov [#allocation13]  }
  0x6e   :  { %3323 = vmatpush3.bf16.msra.mxu0 %v4257_v30  ;;  %s2044_s22 = sshll.u32 %s4103_s6, 4  ;;  %s2045_s22 = int_to_ptr.vmem [resolvable:$true] %s2044_s22 }
  0x6f   :  { %3347 = vmatpush3.bf16.msra.mxu1 %v4261_v31  ;;  %3324 = vmatprep.subr.bf16.mxu0 %v4100_v0  ;;  %s4039_s23 = scalar_lea.vmem %s2045_s22, 128  ;;  %p4044_p13 = scmp.lt.s32.totalorder %s2045_s22, %s2045_s22 }
  0x70   :  { %3348 = vmatprep.subr.bf16.mxu1 %v4100_v0  ;;  %p4040_p12 = scmp.ne.s32.totalorder %s2045_s22, %s4039_s23  ;;  %p4045_p0 = scmp.lt.s32.totalorder %s4039_s23, %s4039_s23 }
  0x72   :  { %3326 = vmatpush3.bf16.msra.mxu0 %v4265_v36  ;;  %p4046_p1 = por %p4045_p0, %p4044_p13 }
  0x73   :  { %3350 = vmatpush3.bf16.msra.mxu1 %v4269_v37  ;;  %3327 = vmatprep.subr.bf16.mxu0 %v4100_v0 }
  0x74   :  { %3351 = vmatprep.subr.bf16.mxu1 %v4100_v0  ;;  %p4047_p2 = pnand %p4046_p1, %p4040_p12 }
  0x76   :  { %3329 = vmatpush3.bf16.msra.mxu0 %v4273_v42 }
  0x77   :  { %3353 = vmatpush3.bf16.msra.mxu1 %v4277_v43  ;;  %3330 = vmatprep.subr.bf16.mxu0 %v4100_v0 }
  0x78   :  { %3354 = vmatprep.subr.bf16.mxu1 %v4100_v0 }
  0x7a   :  { %3332 = vmatpush3.bf16.msra.mxu0 %v4281_v48 }
  0x7b   :  { %3356 = vmatpush3.bf16.msra.mxu1 %v4285_v49  ;;  %3357 = vmatprep.subr.bf16.mxu0 %v4100_v0 }
  0x7c   :  { %3381 = vmatprep.subr.bf16.mxu1 %v4100_v0 }
  0x7d   :  { %2502 = vmatmul.mubr.f32.vlgmr.msra.gmra.mrb[0].mxu0 %v100_v52 }
  0x7e   :  { %2537 = vmatmul.mubr.f32.vlgmr.msra.gmra.mrb[0].mxu1 %v164_v54  ;;  %3359 = vmatpush3.bf16.msra.mxu0 %v4289_v53 }
  0x7f   :  { %3383 = vmatpush3.bf16.msra.mxu1 %v4228_v5  ;;  %3360 = vmatprep.subr.bf16.mxu0 %v4100_v0 }
  0x80   :  { %3384 = vmatprep.subr.bf16.mxu1 %v4100_v0  ;;  %2571 = vmatprep.mubr.msk.f32.mxu0 %vm4101_vm0, %v4102_v1 }
  0x81   :  { %2606 = vmatprep.mubr.msk.f32.mxu1 %vm4101_vm0, %v4102_v1 }
  0x82   :  { %3362 = vmatpush3.bf16.msra.mxu0 %v4295_v57 }
  0x83   :  { %3386 = vmatpush3.bf16.msra.mxu1 %v4233_v12  ;;  %3363 = vmatprep.subr.bf16.mxu0 %v4100_v0 }
  0x84   :  { %3387 = vmatprep.subr.bf16.mxu1 %v4100_v0 }
  0x86   :  { %3365 = vmatpush3.bf16.msra.mxu0 %v4305_v60 }
  0x87   :  { %3389 = vmatpush3.bf16.msra.mxu1 %v4241_v18  ;;  %3366 = vmatprep.subr.bf16.mxu0 %v4100_v0 }
  0x88   :  { %3390 = vmatprep.subr.bf16.mxu1 %v4100_v0 }
  0x8a   :  { %3368 = vmatpush3.bf16.msra.mxu0 %v4311_v63 }
  0x8b   :  { %3392 = vmatpush3.bf16.msra.mxu1 %v4249_v24  ;;  %3369 = vmatprep.subr.bf16.mxu0 %v4100_v0 }
  0x8c   :  { %3393 = vmatprep.subr.bf16.mxu1 %v4100_v0 }
  0x8e   :  { %3371 = vmatpush3.bf16.msra.mxu0 %v4317_v4 }
  0x8f   :  { %3395 = vmatpush3.bf16.msra.mxu1 %v4257_v30  ;;  %3372 = vmatprep.subr.bf16.mxu0 %v4100_v0 }
  0x90   :  { %3396 = vmatprep.subr.bf16.mxu1 %v4100_v0 }
  0x92   :  { %3374 = vmatpush3.bf16.msra.mxu0 %v4323_v8 }
  0x93   :  { %3398 = vmatpush3.bf16.msra.mxu1 %v4265_v36  ;;  %3375 = vmatprep.subr.bf16.mxu0 %v4100_v0 }
  0x94   :  { %3399 = vmatprep.subr.bf16.mxu1 %v4100_v0 }
  0x96   :  { %3377 = vmatpush3.bf16.msra.mxu0 %v4329_v14 }
  0x97   :  { %3401 = vmatpush3.bf16.msra.mxu1 %v4273_v42  ;;  %3378 = vmatprep.subr.bf16.mxu0 %v4100_v0 }
  0x98   :  { %3402 = vmatprep.subr.bf16.mxu1 %v4100_v0 }
  0x9a   :  { %3380 = vmatpush3.bf16.msra.mxu0 %v4340_v17 }
  0x9b   :  { %3404 = vmatpush3.bf16.msra.mxu1 %v4281_v48  ;;  %3405 = vmatprep.subr.bf16.mxu0 %v4100_v0 }
  0x9c   :  { %3429 = vmatprep.subr.bf16.mxu1 %v4100_v0 }
 0x150   :  { %v232_v20 = vpop.f32.mrb[0].mxu0 }
 0x151   :  { %v302_v22 = vpop.f32.mrb[0].mxu1  ;;  %v2503_v23 = vpop.f32.mrb[1].mxu0 }
 0x152   :  { %v303_v26 = vadd.f32 %v302_v22, %v232_v20  ;;  %v2538_v27 = vpop.f32.mrb[1].mxu1  ;;  %v1095_v20 = vld [vmem:[#allocation3 + $0x20] sm:$0xff] }
 0x154   :  { %v306_v28 = vadd.f32 %v4347_v21, %v303_v26 }
 0x156   :  { %2572 = vmatmul.mubr.f32.vlgmr.msra.gmra.mrb[2].mxu0 %v306_v28  ;;  %2607 = vmatmul.mubr.f32.vlgmr.msra.gmra.mrb[2].mxu1 %v306_v28 }
 0x157   :  { %3407 = vmatpush3.bf16.msra.mxu0 %v4230_v9  ;;  %2641 = vmatprep.mubr.msk.f32.mxu0 %vm4101_vm0, %v4102_v1 }
 0x158   :  { %3408 = vmatprep.subr.bf16.mxu0 %v4100_v0  ;;  %3431 = vmatpush3.bf16.msra.mxu1 %v4289_v53 }
 0x159   :  { %3432 = vmatprep.subr.bf16.mxu1 %v4100_v0  ;;  %2676 = vmatprep.mubr.msk.f32.mxu1 %vm4101_vm0, %v4102_v1 }
 0x15b   :  { %3410 = vmatpush3.bf16.msra.mxu0 %v4237_v13 }
 0x15c   :  { %3411 = vmatprep.subr.bf16.mxu0 %v4100_v0  ;;  %3434 = vmatpush3.bf16.msra.mxu1 %v4295_v57 }
 0x15d   :  { %3435 = vmatprep.subr.bf16.mxu1 %v4100_v0 }
 0x15f   :  { %3413 = vmatpush3.bf16.msra.mxu0 %v4245_v19 }
 0x160   :  { %3414 = vmatprep.subr.bf16.mxu0 %v4100_v0  ;;  %3437 = vmatpush3.bf16.msra.mxu1 %v4305_v60 }
 0x161   :  { %3438 = vmatprep.subr.bf16.mxu1 %v4100_v0 }
 0x163   :  { %3416 = vmatpush3.bf16.msra.mxu0 %v4253_v25 }
 0x164   :  { %3417 = vmatprep.subr.bf16.mxu0 %v4100_v0  ;;  %3440 = vmatpush3.bf16.msra.mxu1 %v4311_v63 }
 0x165   :  { %3441 = vmatprep.subr.bf16.mxu1 %v4100_v0 }
 0x167   :  { %3419 = vmatpush3.bf16.msra.mxu0 %v4261_v31 }
 0x168   :  { %3420 = vmatprep.subr.bf16.mxu0 %v4100_v0  ;;  %3443 = vmatpush3.bf16.msra.mxu1 %v4317_v4 }
 0x169   :  { %3444 = vmatprep.subr.bf16.mxu1 %v4100_v0 }
 0x16b   :  { %3422 = vmatpush3.bf16.msra.mxu0 %v4269_v37 }
 0x16c   :  { %3423 = vmatprep.subr.bf16.mxu0 %v4100_v0  ;;  %3446 = vmatpush3.bf16.msra.mxu1 %v4323_v8 }
 0x16d   :  { %3447 = vmatprep.subr.bf16.mxu1 %v4100_v0 }
 0x16f   :  { %3425 = vmatpush3.bf16.msra.mxu0 %v4277_v43 }
 0x170   :  { %3426 = vmatprep.subr.bf16.mxu0 %v4100_v0  ;;  %3449 = vmatpush3.bf16.msra.mxu1 %v4329_v14 }
 0x171   :  { %3450 = vmatprep.subr.bf16.mxu1 %v4100_v0 }
 0x173   :  { %3428 = vmatpush3.bf16.msra.mxu0 %v4285_v49 }
 0x174   :  { %3453 = vmatprep.subr.bf16.mxu0 %v4100_v0  ;;  %3452 = vmatpush3.bf16.msra.mxu1 %v4340_v17 }
 0x175   :  { %3477 = vmatprep.subr.bf16.mxu1 %v4100_v0 }
 0x176   :  { %2642 = vmatmul.mubr.f32.vlgmr.msra.gmra.mrb[4].mxu0 %v396_v29 }
 0x177   :  { %3455 = vmatpush3.bf16.msra.mxu0 %v4228_v5  ;;  %2711 = vmatprep.mubr.msk.f32.mxu0 %vm4101_vm0, %v4102_v1 }
 0x178   :  { %3456 = vmatprep.subr.bf16.mxu0 %v4100_v0 }
 0x17b   :  { %3458 = vmatpush3.bf16.msra.mxu0 %v4233_v12 }
 0x17c   :  { %3459 = vmatprep.subr.bf16.mxu0 %v4100_v0 }
 0x17f   :  { %3461 = vmatpush3.bf16.msra.mxu0 %v4241_v18 }
 0x180   :  { %3462 = vmatprep.subr.bf16.mxu0 %v4100_v0 }
 0x183   :  { %3464 = vmatpush3.bf16.msra.mxu0 %v4249_v24 }
 0x184   :  { %3465 = vmatprep.subr.bf16.mxu0 %v4100_v0 }
 0x187   :  { %3467 = vmatpush3.bf16.msra.mxu0 %v4257_v30 }
 0x188   :  { %3468 = vmatprep.subr.bf16.mxu0 %v4100_v0 }
 0x18b   :  { %3470 = vmatpush3.bf16.msra.mxu0 %v4265_v36 }
 0x18c   :  { %3471 = vmatprep.subr.bf16.mxu0 %v4100_v0 }
 0x18f   :  { %3473 = vmatpush3.bf16.msra.mxu0 %v4273_v42 }
 0x190   :  { %3474 = vmatprep.subr.bf16.mxu0 %v4100_v0 }
 0x193   :  { %3476 = vmatpush3.bf16.msra.mxu0 %v4281_v48 }
 0x194   :  { %3501 = vmatprep.subr.bf16.mxu0 %v4100_v0 }
 0x229   :  { %v373_v33 = vpop.f32.mrb[2].mxu0  ;;  %v464_v34 = vpop.f32.mrb[2].mxu1 }
 0x22a   :  { %v4410_v35 = vadd.f32 %v4407_v32, %v373_v33  ;;  %v2573_v38 = vpop.f32.mrb[3].mxu0  ;;  %v2608_v39 = vpop.f32.mrb[3].mxu1 }
 0x22b   :  { %v1328_v39 = vld [vmem:[#allocation3 + $0x28] sm:$0xff] }
 0x22c   :  { %377 = vmax.xlane.f32.xlu0 %v4410_v35 }
 0x249   :  { %v534_v40 = vpop.f32.mrb[4].mxu0 }
 0x24a   :  { %v535_v41 = vadd.f32 %v534_v40, %v464_v34  ;;  %v2643_v44 = vpop.f32.mrb[5].mxu0 }
 0x24c   :  { %v538_v45 = vadd.f32 %v4347_v21, %v535_v41 }
 0x24e   :  { %2677 = vmatmul.mubr.f32.vlgmr.msra.gmra.mrb[4].mxu1 %v538_v45  ;;  %2712 = vmatmul.mubr.f32.vlgmr.msra.gmra.mrb[6].mxu0 %v538_v45 }
 0x24f   :  { %3479 = vmatpush3.bf16.msra.mxu1 %v4230_v9  ;;  %2746 = vmatprep.mubr.msk.f32.mxu1 %vm4101_vm0, %v4102_v1 }
 0x250   :  { %3480 = vmatprep.subr.bf16.mxu1 %v4100_v0  ;;  %3503 = vmatpush3.bf16.msra.mxu0 %v4289_v53 }
 0x251   :  { %3504 = vmatprep.subr.bf16.mxu0 %v4100_v0  ;;  %2781 = vmatprep.mubr.msk.f32.mxu0 %vm4101_vm0, %v4102_v1 }
 0x253   :  { %3482 = vmatpush3.bf16.msra.mxu1 %v4237_v13 }
 0x254   :  { %3483 = vmatprep.subr.bf16.mxu1 %v4100_v0  ;;  %3506 = vmatpush3.bf16.msra.mxu0 %v4295_v57 }
 0x255   :  { %3507 = vmatprep.subr.bf16.mxu0 %v4100_v0 }
 0x257   :  { %3485 = vmatpush3.bf16.msra.mxu1 %v4245_v19 }
 0x258   :  { %3486 = vmatprep.subr.bf16.mxu1 %v4100_v0  ;;  %3509 = vmatpush3.bf16.msra.mxu0 %v4305_v60 }
 0x259   :  { %3510 = vmatprep.subr.bf16.mxu0 %v4100_v0 }
 0x25b   :  { %3488 = vmatpush3.bf16.msra.mxu1 %v4253_v25 }
 0x25c   :  { %3489 = vmatprep.subr.bf16.mxu1 %v4100_v0  ;;  %3512 = vmatpush3.bf16.msra.mxu0 %v4311_v63 }
 0x25d   :  { %3513 = vmatprep.subr.bf16.mxu0 %v4100_v0 }
 0x25f   :  { %3491 = vmatpush3.bf16.msra.mxu1 %v4261_v31 }
 0x260   :  { %3492 = vmatprep.subr.bf16.mxu1 %v4100_v0  ;;  %3515 = vmatpush3.bf16.msra.mxu0 %v4317_v4 }
 0x261   :  { %3516 = vmatprep.subr.bf16.mxu0 %v4100_v0 }
 0x263   :  { %3494 = vmatpush3.bf16.msra.mxu1 %v4269_v37 }
 0x264   :  { %3495 = vmatprep.subr.bf16.mxu1 %v4100_v0  ;;  %3518 = vmatpush3.bf16.msra.mxu0 %v4323_v8 }
 0x265   :  { %3519 = vmatprep.subr.bf16.mxu0 %v4100_v0 }
 0x267   :  { %3497 = vmatpush3.bf16.msra.mxu1 %v4277_v43 }
 0x268   :  { %3498 = vmatprep.subr.bf16.mxu1 %v4100_v0  ;;  %3521 = vmatpush3.bf16.msra.mxu0 %v4329_v14 }
 0x269   :  { %3522 = vmatprep.subr.bf16.mxu0 %v4100_v0 }
 0x26b   :  { %3500 = vmatpush3.bf16.msra.mxu1 %v4285_v49 }
 0x26c   :  { %3525 = vmatprep.subr.bf16.mxu1 %v4100_v0  ;;  %3524 = vmatpush3.bf16.msra.mxu0 %v4340_v17 }
 0x26d   :  { %3549 = vmatprep.subr.bf16.mxu0 %v4100_v0 }
 0x26e   :  { %2747 = vmatmul.mubr.f32.vlgmr.msra.gmra.mrb[6].mxu1 %v629_v46 }
 0x26f   :  { %3527 = vmatpush3.bf16.msra.mxu1 %v4228_v5  ;;  %2816 = vmatprep.mubr.msk.f32.mxu1 %vm4101_vm0, %v4102_v1 }
 0x270   :  { %3528 = vmatprep.subr.bf16.mxu1 %v4100_v0 }
 0x273   :  { %3530 = vmatpush3.bf16.msra.mxu1 %v4233_v12 }
 0x274   :  { %3531 = vmatprep.subr.bf16.mxu1 %v4100_v0 }
 0x277   :  { %3533 = vmatpush3.bf16.msra.mxu1 %v4241_v18 }
 0x278   :  { %3534 = vmatprep.subr.bf16.mxu1 %v4100_v0 }
 0x27b   :  { %3536 = vmatpush3.bf16.msra.mxu1 %v4249_v24 }
 0x27c   :  { %3537 = vmatprep.subr.bf16.mxu1 %v4100_v0 }
 0x27f   :  { %3539 = vmatpush3.bf16.msra.mxu1 %v4257_v30 }
 0x280   :  { %3540 = vmatprep.subr.bf16.mxu1 %v4100_v0 }
 0x283   :  { %3542 = vmatpush3.bf16.msra.mxu1 %v4265_v36 }
 0x284   :  { %3543 = vmatprep.subr.bf16.mxu1 %v4100_v0 }
 0x287   :  { %3545 = vmatpush3.bf16.msra.mxu1 %v4273_v42 }
 0x288   :  { %3546 = vmatprep.subr.bf16.mxu1 %v4100_v0 }
 0x28b   :  { %3548 = vmatpush3.bf16.msra.mxu1 %v4281_v48 }
 0x28c   :  { %3573 = vmatprep.subr.bf16.mxu1 %v4100_v0 }
 0x321   :  { %v605_v47 = vpop.f32.mrb[4].mxu1  ;;  %v697_v50 = vpop.f32.mrb[6].mxu0 }
 0x322   :  { %v4469_v51 = vadd.f32 %v4407_v32, %v605_v47  ;;  %v2678_v52 = vpop.f32.mrb[5].mxu1  ;;  %v2713_v54 = vpop.f32.mrb[7].mxu0 }
 0x324   :  { %609 = vmax.xlane.f32.xlu0 %v4469_v51 }
 0x341   :  { %v767_v55 = vpop.f32.mrb[6].mxu1 }
 0x342   :  { %v768_v56 = vadd.f32 %v767_v55, %v697_v50  ;;  %v2748_v58 = vpop.f32.mrb[7].mxu1  ;;  %v1561_v55 = vld [vmem:[#allocation3 + $0x30] sm:$0xff] }
 0x344   :  { %v771_v59 = vadd.f32 %v4347_v21, %v768_v56 }
 0x346   :  { %2782 = vmatmul.mubr.f32.vlgmr.msra.gmra.mrb[8].mxu0 %v771_v59  ;;  %2817 = vmatmul.mubr.f32.vlgmr.msra.gmra.mrb[8].mxu1 %v771_v59 }
 0x347   :  { %3551 = vmatpush3.bf16.msra.mxu0 %v4230_v9  ;;  %2851 = vmatprep.mubr.msk.f32.mxu0 %vm4101_vm0, %v4102_v1 }
 0x348   :  { %3552 = vmatprep.subr.bf16.mxu0 %v4100_v0  ;;  %3575 = vmatpush3.bf16.msra.mxu1 %v4289_v53 }
 0x349   :  { %3576 = vmatprep.subr.bf16.mxu1 %v4100_v0  ;;  %2886 = vmatprep.mubr.msk.f32.mxu1 %vm4101_vm0, %v4102_v1 }
 0x34b   :  { %3554 = vmatpush3.bf16.msra.mxu0 %v4237_v13 }
 0x34c   :  { %3555 = vmatprep.subr.bf16.mxu0 %v4100_v0  ;;  %3578 = vmatpush3.bf16.msra.mxu1 %v4295_v57 }
 0x34d   :  { %3579 = vmatprep.subr.bf16.mxu1 %v4100_v0 }
 0x34f   :  { %3557 = vmatpush3.bf16.msra.mxu0 %v4245_v19 }
 0x350   :  { %3558 = vmatprep.subr.bf16.mxu0 %v4100_v0  ;;  %3581 = vmatpush3.bf16.msra.mxu1 %v4305_v60 }
 0x351   :  { %3582 = vmatprep.subr.bf16.mxu1 %v4100_v0 }
 0x353   :  { %3560 = vmatpush3.bf16.msra.mxu0 %v4253_v25 }
 0x354   :  { %3561 = vmatprep.subr.bf16.mxu0 %v4100_v0  ;;  %3584 = vmatpush3.bf16.msra.mxu1 %v4311_v63 }
 0x355   :  { %3585 = vmatprep.subr.bf16.mxu1 %v4100_v0 }
 0x357   :  { %3563 = vmatpush3.bf16.msra.mxu0 %v4261_v31 }
 0x358   :  { %3564 = vmatprep.subr.bf16.mxu0 %v4100_v0  ;;  %3587 = vmatpush3.bf16.msra.mxu1 %v4317_v4 }
 0x359   :  { %3588 = vmatprep.subr.bf16.mxu1 %v4100_v0 }
 0x35b   :  { %3566 = vmatpush3.bf16.msra.mxu0 %v4269_v37 }
 0x35c   :  { %3567 = vmatprep.subr.bf16.mxu0 %v4100_v0  ;;  %3590 = vmatpush3.bf16.msra.mxu1 %v4323_v8 }
 0x35d   :  { %3591 = vmatprep.subr.bf16.mxu1 %v4100_v0 }
 0x35f   :  { %3569 = vmatpush3.bf16.msra.mxu0 %v4277_v43 }
 0x360   :  { %3570 = vmatprep.subr.bf16.mxu0 %v4100_v0  ;;  %3593 = vmatpush3.bf16.msra.mxu1 %v4329_v14 }
 0x361   :  { %3594 = vmatprep.subr.bf16.mxu1 %v4100_v0 }
 0x363   :  { %3572 = vmatpush3.bf16.msra.mxu0 %v4285_v49 }
 0x364   :  { %3597 = vmatprep.subr.bf16.mxu0 %v4100_v0  ;;  %3596 = vmatpush3.bf16.msra.mxu1 %v4340_v17 }
 0x365   :  { %3621 = vmatprep.subr.bf16.mxu1 %v4100_v0 }
 0x366   :  { %2852 = vmatmul.mubr.f32.vlgmr.msra.gmra.mrb[10].mxu0 %v862_v61 }
 0x367   :  { %3599 = vmatpush3.bf16.msra.mxu0 %v4228_v5  ;;  %2921 = vmatprep.mubr.msk.f32.mxu0 %vm4101_vm0, %v4102_v1 }
 0x368   :  { %3600 = vmatprep.subr.bf16.mxu0 %v4100_v0 }
 0x36b   :  { %3602 = vmatpush3.bf16.msra.mxu0 %v4233_v12 }
 0x36c   :  { %3603 = vmatprep.subr.bf16.mxu0 %v4100_v0 }
 0x36f   :  { %3605 = vmatpush3.bf16.msra.mxu0 %v4241_v18 }
 0x370   :  { %3606 = vmatprep.subr.bf16.mxu0 %v4100_v0 }
 0x373   :  { %3608 = vmatpush3.bf16.msra.mxu0 %v4249_v24 }
 0x374   :  { %3609 = vmatprep.subr.bf16.mxu0 %v4100_v0 }
 0x377   :  { %3611 = vmatpush3.bf16.msra.mxu0 %v4257_v30 }
 0x378   :  { %3612 = vmatprep.subr.bf16.mxu0 %v4100_v0 }
 0x37b   :  { %3614 = vmatpush3.bf16.msra.mxu0 %v4265_v36 }
 0x37c   :  { %3615 = vmatprep.subr.bf16.mxu0 %v4100_v0 }
 0x37f   :  { %3617 = vmatpush3.bf16.msra.mxu0 %v4273_v42 }
 0x380   :  { %3618 = vmatprep.subr.bf16.mxu0 %v4100_v0 }
 0x383   :  { %3620 = vmatpush3.bf16.msra.mxu0 %v4281_v48 }
 0x384   :  { %3645 = vmatprep.subr.bf16.mxu0 %v4100_v0 }
 0x419   :  { %v838_v62 = vpop.f32.mrb[8].mxu0  ;;  %v930_v2 = vpop.f32.mrb[8].mxu1 }
 0x41a   :  { %v4528_v3 = vadd.f32 %v4407_v32, %v838_v62  ;;  %v2783_v6 = vpop.f32.mrb[9].mxu0  ;;  %v2818_v7 = vpop.f32.mrb[9].mxu1 }
 0x41c   :  { %842 = vmax.xlane.f32.xlu1 %v4528_v3 }
 0x439   :  { %v1000_v10 = vpop.f32.mrb[10].mxu0 }
 0x43a   :  { %v1001_v11 = vadd.f32 %v1000_v10, %v930_v2  ;;  %v2853_v15 = vpop.f32.mrb[11].mxu0 }
 0x43c   :  { %v1004_v16 = vadd.f32 %v4347_v21, %v1001_v11 }
 0x43e   :  { %2887 = vmatmul.mubr.f32.vlgmr.msra.gmra.mrb[10].mxu1 %v1004_v16  ;;  %2922 = vmatmul.mubr.f32.vlgmr.msra.gmra.mrb[12].mxu0 %v1004_v16 }
 0x43f   :  { %3623 = vmatpush3.bf16.msra.mxu1 %v4230_v9  ;;  %2956 = vmatprep.mubr.msk.f32.mxu1 %vm4101_vm0, %v4102_v1 }
 0x440   :  { %3624 = vmatprep.subr.bf16.mxu1 %v4100_v0  ;;  %3647 = vmatpush3.bf16.msra.mxu0 %v4289_v53 }
 0x441   :  { %3648 = vmatprep.subr.bf16.mxu0 %v4100_v0  ;;  %2991 = vmatprep.mubr.msk.f32.mxu0 %vm4101_vm0, %v4102_v1 }
 0x443   :  { %3626 = vmatpush3.bf16.msra.mxu1 %v4237_v13 }
 0x444   :  { %3627 = vmatprep.subr.bf16.mxu1 %v4100_v0  ;;  %3650 = vmatpush3.bf16.msra.mxu0 %v4295_v57 }
 0x445   :  { %3651 = vmatprep.subr.bf16.mxu0 %v4100_v0 }
 0x447   :  { %3629 = vmatpush3.bf16.msra.mxu1 %v4245_v19 }
 0x448   :  { %3630 = vmatprep.subr.bf16.mxu1 %v4100_v0  ;;  %3653 = vmatpush3.bf16.msra.mxu0 %v4305_v60 }
 0x449   :  { %3654 = vmatprep.subr.bf16.mxu0 %v4100_v0 }
 0x44b   :  { %3632 = vmatpush3.bf16.msra.mxu1 %v4253_v25 }
 0x44c   :  { %3633 = vmatprep.subr.bf16.mxu1 %v4100_v0  ;;  %3656 = vmatpush3.bf16.msra.mxu0 %v4311_v63 }
 0x44d   :  { %3657 = vmatprep.subr.bf16.mxu0 %v4100_v0 }
 0x44f   :  { %3635 = vmatpush3.bf16.msra.mxu1 %v4261_v31 }
 0x450   :  { %3636 = vmatprep.subr.bf16.mxu1 %v4100_v0  ;;  %3659 = vmatpush3.bf16.msra.mxu0 %v4317_v4 }
 0x451   :  { %3660 = vmatprep.subr.bf16.mxu0 %v4100_v0 }
 0x453   :  { %3638 = vmatpush3.bf16.msra.mxu1 %v4269_v37 }
 0x454   :  { %3639 = vmatprep.subr.bf16.mxu1 %v4100_v0  ;;  %3662 = vmatpush3.bf16.msra.mxu0 %v4323_v8 }
 0x455   :  { %3663 = vmatprep.subr.bf16.mxu0 %v4100_v0 }
 0x457   :  { %3641 = vmatpush3.bf16.msra.mxu1 %v4277_v43 }
 0x458   :  { %3642 = vmatprep.subr.bf16.mxu1 %v4100_v0  ;;  %3665 = vmatpush3.bf16.msra.mxu0 %v4329_v14 }
 0x459   :  { %3666 = vmatprep.subr.bf16.mxu0 %v4100_v0 }
 0x45b   :  { %3644 = vmatpush3.bf16.msra.mxu1 %v4285_v49 }
 0x45c   :  { %3669 = vmatprep.subr.bf16.mxu1 %v4100_v0  ;;  %3668 = vmatpush3.bf16.msra.mxu0 %v4340_v17 }
 0x45d   :  { %3693 = vmatprep.subr.bf16.mxu0 %v4100_v0 }
 0x45e   :  { %2957 = vmatmul.mubr.f32.vlgmr.msra.gmra.mrb[12].mxu1 %v1095_v20 }
 0x45f   :  { %3671 = vmatpush3.bf16.msra.mxu1 %v4228_v5  ;;  %3026 = vmatprep.mubr.msk.f32.mxu1 %vm4101_vm0, %v4102_v1 }
 0x460   :  { %3672 = vmatprep.subr.bf16.mxu1 %v4100_v0 }
 0x463   :  { %3674 = vmatpush3.bf16.msra.mxu1 %v4233_v12 }
 0x464   :  { %3675 = vmatprep.subr.bf16.mxu1 %v4100_v0 }
 0x467   :  { %3677 = vmatpush3.bf16.msra.mxu1 %v4241_v18 }
 0x468   :  { %3678 = vmatprep.subr.bf16.mxu1 %v4100_v0 }
 0x46b   :  { %3680 = vmatpush3.bf16.msra.mxu1 %v4249_v24 }
 0x46c   :  { %3681 = vmatprep.subr.bf16.mxu1 %v4100_v0 }
 0x46f   :  { %3683 = vmatpush3.bf16.msra.mxu1 %v4257_v30 }
 0x470   :  { %3684 = vmatprep.subr.bf16.mxu1 %v4100_v0 }
 0x473   :  { %3686 = vmatpush3.bf16.msra.mxu1 %v4265_v36 }
 0x474   :  { %3687 = vmatprep.subr.bf16.mxu1 %v4100_v0 }
 0x477   :  { %3689 = vmatpush3.bf16.msra.mxu1 %v4273_v42 }
 0x478   :  { %3690 = vmatprep.subr.bf16.mxu1 %v4100_v0 }
 0x47b   :  { %3692 = vmatpush3.bf16.msra.mxu1 %v4281_v48 }
 0x47c   :  { %3717 = vmatprep.subr.bf16.mxu1 %v4100_v0 }
 0x511   :  { %v1071_v22 = vpop.f32.mrb[10].mxu1  ;;  %v1163_v23 = vpop.f32.mrb[12].mxu0 }
 0x512   :  { %v4587_v26 = vadd.f32 %v4407_v32, %v1071_v22  ;;  %v2888_v27 = vpop.f32.mrb[11].mxu1  ;;  %v2923_v28 = vpop.f32.mrb[13].mxu0 }
 0x514   :  { %1075 = vmax.xlane.f32.xlu1 %v4587_v26 }
 0x531   :  { %v1233_v29 = vpop.f32.mrb[12].mxu1 }
 0x532   :  { %v1234_v33 = vadd.f32 %v1233_v29, %v1163_v23  ;;  %v2958_v34 = vpop.f32.mrb[13].mxu1 }
 0x534   :  { %v1237_v38 = vadd.f32 %v4347_v21, %v1234_v33 }
 0x536   :  { %2992 = vmatmul.mubr.f32.vlgmr.msra.gmra.mrb[14].mxu0 %v1237_v38  ;;  %3027 = vmatmul.mubr.f32.vlgmr.msra.gmra.mrb[14].mxu1 %v1237_v38 }
 0x537   :  { %3695 = vmatpush3.bf16.msra.mxu0 %v4230_v9  ;;  %3061 = vmatprep.mubr.msk.f32.mxu0 %vm4101_vm0, %v4102_v1 }
 0x538   :  { %3696 = vmatprep.subr.bf16.mxu0 %v4100_v0  ;;  %3719 = vmatpush3.bf16.msra.mxu1 %v4289_v53 }
 0x539   :  { %3720 = vmatprep.subr.bf16.mxu1 %v4100_v0  ;;  %3096 = vmatprep.mubr.msk.f32.mxu1 %vm4101_vm0, %v4102_v1 }
 0x53b   :  { %3698 = vmatpush3.bf16.msra.mxu0 %v4237_v13 }
 0x53c   :  { %3699 = vmatprep.subr.bf16.mxu0 %v4100_v0  ;;  %3722 = vmatpush3.bf16.msra.mxu1 %v4295_v57 }
 0x53d   :  { %3723 = vmatprep.subr.bf16.mxu1 %v4100_v0 }
 0x53f   :  { %3701 = vmatpush3.bf16.msra.mxu0 %v4245_v19 }
 0x540   :  { %3702 = vmatprep.subr.bf16.mxu0 %v4100_v0  ;;  %3725 = vmatpush3.bf16.msra.mxu1 %v4305_v60 }
 0x541   :  { %3726 = vmatprep.subr.bf16.mxu1 %v4100_v0 }
 0x543   :  { %3704 = vmatpush3.bf16.msra.mxu0 %v4253_v25 }
 0x544   :  { %3705 = vmatprep.subr.bf16.mxu0 %v4100_v0  ;;  %3728 = vmatpush3.bf16.msra.mxu1 %v4311_v63 }
 0x545   :  { %3729 = vmatprep.subr.bf16.mxu1 %v4100_v0 }
 0x547   :  { %3707 = vmatpush3.bf16.msra.mxu0 %v4261_v31 }
 0x548   :  { %3708 = vmatprep.subr.bf16.mxu0 %v4100_v0  ;;  %3731 = vmatpush3.bf16.msra.mxu1 %v4317_v4 }
 0x549   :  { %3732 = vmatprep.subr.bf16.mxu1 %v4100_v0 }
 0x54b   :  { %3710 = vmatpush3.bf16.msra.mxu0 %v4269_v37 }
 0x54c   :  { %3711 = vmatprep.subr.bf16.mxu0 %v4100_v0  ;;  %3734 = vmatpush3.bf16.msra.mxu1 %v4323_v8 }
 0x54d   :  { %3735 = vmatprep.subr.bf16.mxu1 %v4100_v0 }
 0x54f   :  { %3713 = vmatpush3.bf16.msra.mxu0 %v4277_v43 }
 0x550   :  { %3714 = vmatprep.subr.bf16.mxu0 %v4100_v0  ;;  %3737 = vmatpush3.bf16.msra.mxu1 %v4329_v14 }
 0x551   :  { %3738 = vmatprep.subr.bf16.mxu1 %v4100_v0 }
 0x553   :  { %3716 = vmatpush3.bf16.msra.mxu0 %v4285_v49 }
 0x554   :  { %3741 = vmatprep.subr.bf16.mxu0 %v4100_v0  ;;  %3740 = vmatpush3.bf16.msra.mxu1 %v4340_v17 }
 0x555   :  { %3765 = vmatprep.subr.bf16.mxu1 %v4100_v0 }
 0x556   :  { %3062 = vmatmul.mubr.f32.vlgmr.msra.gmra.mrb[16].mxu0 %v1328_v39 }
 0x557   :  { %3743 = vmatpush3.bf16.msra.mxu0 %v4228_v5  ;;  %3131 = vmatprep.mubr.msk.f32.mxu0 %vm4101_vm0, %v4102_v1 }
 0x558   :  { %3744 = vmatprep.subr.bf16.mxu0 %v4100_v0 }
 0x55b   :  { %3746 = vmatpush3.bf16.msra.mxu0 %v4233_v12 }
 0x55c   :  { %3747 = vmatprep.subr.bf16.mxu0 %v4100_v0 }
 0x55f   :  { %3749 = vmatpush3.bf16.msra.mxu0 %v4241_v18 }
 0x560   :  { %3750 = vmatprep.subr.bf16.mxu0 %v4100_v0 }
 0x563   :  { %3752 = vmatpush3.bf16.msra.mxu0 %v4249_v24 }
 0x564   :  { %3753 = vmatprep.subr.bf16.mxu0 %v4100_v0 }
 0x567   :  { %3755 = vmatpush3.bf16.msra.mxu0 %v4257_v30 }
 0x568   :  { %3756 = vmatprep.subr.bf16.mxu0 %v4100_v0 }
 0x56b   :  { %3758 = vmatpush3.bf16.msra.mxu0 %v4265_v36 }
 0x56c   :  { %3759 = vmatprep.subr.bf16.mxu0 %v4100_v0 }
 0x56f   :  { %3761 = vmatpush3.bf16.msra.mxu0 %v4273_v42 }
 0x570   :  { %3762 = vmatprep.subr.bf16.mxu0 %v4100_v0 }
 0x573   :  { %3764 = vmatpush3.bf16.msra.mxu0 %v4281_v48 }
 0x574   :  { %3789 = vmatprep.subr.bf16.mxu0 %v4100_v0 }
 0x609   :  { %v1304_v40 = vpop.f32.mrb[14].mxu0  ;;  %v1396_v41 = vpop.f32.mrb[14].mxu1 }
 0x60a   :  { %v4646_v44 = vadd.f32 %v4407_v32, %v1304_v40  ;;  %v2993_v45 = vpop.f32.mrb[15].mxu0  ;;  %v3028_v46 = vpop.f32.mrb[15].mxu1 }
 0x60c   :  { %1308 = vmax.xlane.f32.xlu0 %v4646_v44 }
 0x629   :  { %v1466_v47 = vpop.f32.mrb[16].mxu0 }
 0x62a   :  { %v1467_v50 = vadd.f32 %v1466_v47, %v1396_v41  ;;  %v3063_v52 = vpop.f32.mrb[17].mxu0 }
 0x62c   :  { %v1470_v54 = vadd.f32 %v4347_v21, %v1467_v50 }
 0x62e   :  { %3097 = vmatmul.mubr.f32.vlgmr.msra.gmra.mrb[16].mxu1 %v1470_v54  ;;  %3132 = vmatmul.mubr.f32.vlgmr.msra.gmra.mrb[18].mxu0 %v1470_v54 }
 0x62f   :  { %3767 = vmatpush3.bf16.msra.mxu1 %v4230_v9  ;;  %3166 = vmatprep.mubr.msk.f32.mxu1 %vm4101_vm0, %v4102_v1 }
 0x630   :  { %3768 = vmatprep.subr.bf16.mxu1 %v4100_v0  ;;  %3791 = vmatpush3.bf16.msra.mxu0 %v4289_v53 }
 0x631   :  { %3792 = vmatprep.subr.bf16.mxu0 %v4100_v0  ;;  %3201 = vmatprep.mubr.msk.f32.mxu0 %vm4101_vm0, %v4102_v1 }
 0x633   :  { %3770 = vmatpush3.bf16.msra.mxu1 %v4237_v13 }
 0x634   :  { %3771 = vmatprep.subr.bf16.mxu1 %v4100_v0  ;;  %3794 = vmatpush3.bf16.msra.mxu0 %v4295_v57 }
 0x635   :  { %3795 = vmatprep.subr.bf16.mxu0 %v4100_v0 }
 0x637   :  { %3773 = vmatpush3.bf16.msra.mxu1 %v4245_v19 }
 0x638   :  { %3774 = vmatprep.subr.bf16.mxu1 %v4100_v0  ;;  %3797 = vmatpush3.bf16.msra.mxu0 %v4305_v60 }
 0x639   :  { %3798 = vmatprep.subr.bf16.mxu0 %v4100_v0 }
 0x63b   :  { %3776 = vmatpush3.bf16.msra.mxu1 %v4253_v25 }
 0x63c   :  { %3777 = vmatprep.subr.bf16.mxu1 %v4100_v0  ;;  %3800 = vmatpush3.bf16.msra.mxu0 %v4311_v63 }
 0x63d   :  { %3801 = vmatprep.subr.bf16.mxu0 %v4100_v0 }
 0x63f   :  { %3779 = vmatpush3.bf16.msra.mxu1 %v4261_v31 }
 0x640   :  { %3780 = vmatprep.subr.bf16.mxu1 %v4100_v0  ;;  %3803 = vmatpush3.bf16.msra.mxu0 %v4317_v4 }
 0x641   :  { %3804 = vmatprep.subr.bf16.mxu0 %v4100_v0 }
 0x643   :  { %3782 = vmatpush3.bf16.msra.mxu1 %v4269_v37 }
 0x644   :  { %3783 = vmatprep.subr.bf16.mxu1 %v4100_v0  ;;  %3806 = vmatpush3.bf16.msra.mxu0 %v4323_v8 }
 0x645   :  { %3807 = vmatprep.subr.bf16.mxu0 %v4100_v0 }
 0x647   :  { %3785 = vmatpush3.bf16.msra.mxu1 %v4277_v43 }
 0x648   :  { %3786 = vmatprep.subr.bf16.mxu1 %v4100_v0  ;;  %3809 = vmatpush3.bf16.msra.mxu0 %v4329_v14 }
 0x649   :  { %3810 = vmatprep.subr.bf16.mxu0 %v4100_v0 }
 0x64b   :  { %3788 = vmatpush3.bf16.msra.mxu1 %v4285_v49 }
 0x64c   :  { %3813 = vmatprep.subr.bf16.mxu1 %v4100_v0  ;;  %3812 = vmatpush3.bf16.msra.mxu0 %v4340_v17 }
 0x64d   :  { %3837 = vmatprep.subr.bf16.mxu0 %v4100_v0 }
 0x64e   :  { %3167 = vmatmul.mubr.f32.vlgmr.msra.gmra.mrb[18].mxu1 %v1561_v55 }
 0x64f   :  { %3815 = vmatpush3.bf16.msra.mxu1 %v4228_v5  ;;  %3236 = vmatprep.mubr.msk.f32.mxu1 %vm4101_vm0, %v4102_v1 }
 0x650   :  { %3816 = vmatprep.subr.bf16.mxu1 %v4100_v0 }
 0x653   :  { %3818 = vmatpush3.bf16.msra.mxu1 %v4233_v12 }
 0x654   :  { %3819 = vmatprep.subr.bf16.mxu1 %v4100_v0 }
 0x657   :  { %3821 = vmatpush3.bf16.msra.mxu1 %v4241_v18 }
 0x658   :  { %3822 = vmatprep.subr.bf16.mxu1 %v4100_v0 }
 0x65b   :  { %3824 = vmatpush3.bf16.msra.mxu1 %v4249_v24 }
 0x65c   :  { %3825 = vmatprep.subr.bf16.mxu1 %v4100_v0 }
 0x65f   :  { %3827 = vmatpush3.bf16.msra.mxu1 %v4257_v30 }
 0x660   :  { %3828 = vmatprep.subr.bf16.mxu1 %v4100_v0 }
 0x663   :  { %3830 = vmatpush3.bf16.msra.mxu1 %v4265_v36 }
 0x664   :  { %3831 = vmatprep.subr.bf16.mxu1 %v4100_v0 }
 0x667   :  { %3833 = vmatpush3.bf16.msra.mxu1 %v4273_v42 }
 0x668   :  { %3834 = vmatprep.subr.bf16.mxu1 %v4100_v0 }
 0x66b   :  { %3836 = vmatpush3.bf16.msra.mxu1 %v4281_v48 }
 0x66c   :  { %3861 = vmatprep.subr.bf16.mxu1 %v4100_v0 }
 0x701   :  { %v1537_v5 = vpop.f32.mrb[16].mxu1  ;;  %v1629_v12 = vpop.f32.mrb[18].mxu0 }
 0x702   :  { %v4705_v18 = vadd.f32 %v4407_v32, %v1537_v5  ;;  %v3098_v24 = vpop.f32.mrb[17].mxu1  ;;  %v3133_v30 = vpop.f32.mrb[19].mxu0 }
 0x704   :  { %1541 = vmax.xlane.f32.xlu1 %v4705_v18 }
 0x721   :  { %v1699_v36 = vpop.f32.mrb[18].mxu1 }
 0x722   :  { %v1700_v56 = vadd.f32 %v1699_v36, %v1629_v12  ;;  %v3168_v58 = vpop.f32.mrb[19].mxu1 }
 0x724   :  { %v1703_v42 = vadd.f32 %v4347_v21, %v1700_v56 }
 0x726   :  { %3202 = vmatmul.mubr.f32.vlgmr.msra.gmra.mrb[20].mxu0 %v1703_v42  ;;  %3237 = vmatmul.mubr.f32.vlgmr.msra.gmra.mrb[20].mxu1 %v1703_v42 }
 0x727   :  { %3839 = vmatpush3.bf16.msra.mxu0 %v4230_v9  ;;  %3271 = vmatprep.mubr.msk.f32.mxu0 %vm4101_vm0, %v4102_v1  ;;  %v378_v9 = vpop.xlane.xlu0 %377 }
 0x728   :  { %3840 = vmatprep.subr.bf16.mxu0 %v4100_v0  ;;  %3863 = vmatpush3.bf16.msra.mxu1 %v4289_v53 }
 0x729   :  { %3864 = vmatprep.subr.bf16.mxu1 %v4100_v0  ;;  %3306 = vmatprep.mubr.msk.f32.mxu1 %vm4101_vm0, %v4102_v1  ;;  %v1794_v1 = vld [vmem:[#allocation3 + $0x38] sm:$0xff] }
 0x72b   :  { %3842 = vmatpush3.bf16.msra.mxu0 %v4237_v13  ;;  %v379_v13 = vsub.f32 %v4410_v35, %v378_v9 }
 0x72c   :  { %3843 = vmatprep.subr.bf16.mxu0 %v4100_v0  ;;  %3866 = vmatpush3.bf16.msra.mxu1 %v4295_v57 }
 0x72d   :  { %3867 = vmatprep.subr.bf16.mxu1 %v4100_v0 }
 0x72f   :  { %3845 = vmatpush3.bf16.msra.mxu0 %v4245_v19  ;;  %v610_v19 = vpop.xlane.xlu0 %609 }
 0x730   :  { %3846 = vmatprep.subr.bf16.mxu0 %v4100_v0  ;;  %3869 = vmatpush3.bf16.msra.mxu1 %v4305_v60  ;;  %v611_v34 = vsub.f32 %v4469_v51, %v610_v19 }
 0x731   :  { %3870 = vmatprep.subr.bf16.mxu1 %v4100_v0 }
 0x732   :  { %v612_v39 = vmul.f32 1.442695, %v611_v34 }
 0x733   :  { %3848 = vmatpush3.bf16.msra.mxu0 %v4253_v25  ;;  %v843_v25 = vpop.xlane.xlu1 %842 }
 0x734   :  { %3849 = vmatprep.subr.bf16.mxu0 %v4100_v0  ;;  %3872 = vmatpush3.bf16.msra.mxu1 %v4311_v63 }
 0x735   :  { %3873 = vmatprep.subr.bf16.mxu1 %v4100_v0 }
 0x737   :  { %3851 = vmatpush3.bf16.msra.mxu0 %v4261_v31  ;;  %v380_v31 = vmul.f32 1.442695, %v379_v13  ;;  %v1076_v38 = vpop.xlane.xlu1 %1075 }
 0x738   :  { %3852 = vmatprep.subr.bf16.mxu0 %v4100_v0  ;;  %3875 = vmatpush3.bf16.msra.mxu1 %v4317_v4  ;;  %v1077_v40 = vsub.f32 %v4587_v26, %v1076_v38 }
 0x739   :  { %3876 = vmatprep.subr.bf16.mxu1 %v4100_v0  ;;  %3897 = vpow2.f32 %v380_v31 }
 0x73b   :  { %3854 = vmatpush3.bf16.msra.mxu0 %v4269_v37  ;;  %v844_v37 = vsub.f32 %v4528_v3, %v843_v25 }
 0x73c   :  { %3855 = vmatprep.subr.bf16.mxu0 %v4100_v0  ;;  %3878 = vmatpush3.bf16.msra.mxu1 %v4323_v8 }
 0x73d   :  { %3879 = vmatprep.subr.bf16.mxu1 %v4100_v0  ;;  %v845_v48 = vmul.f32 1.442695, %v844_v37 }
 0x73f   :  { %3857 = vmatpush3.bf16.msra.mxu0 %v4277_v43  ;;  %v1309_v43 = vpop.xlane.xlu0 %1308  ;;  %3899 = vpow2.f32 %v845_v48 }
 0x740   :  { %3858 = vmatprep.subr.bf16.mxu0 %v4100_v0  ;;  %3881 = vmatpush3.bf16.msra.mxu1 %v4329_v14  ;;  %v1310_v53 = vsub.f32 %v4646_v44, %v1309_v43  ;;  %v1078_v44 = vmul.f32 1.442695, %v1077_v40 }
 0x741   :  { %3882 = vmatprep.subr.bf16.mxu1 %v4100_v0 }
 0x742   :  { %v1311_v0 = vmul.f32 1.442695, %v1310_v53 }
 0x743   :  { %3860 = vmatpush3.bf16.msra.mxu0 %v4285_v49  ;;  %v3898_v8 = vpop.eup %3897 }
 0x744   :  { %3884 = vmatpush3.bf16.msra.mxu1 %v4340_v17  ;;  %3901 = vpow2.f32 %v1311_v0 }
 0x746   :  { %3272 = vmatmul.mubr.f32.vlgmr.msra.gmra.mrb[22].mxu0 %v1794_v1 }
 0x749   :  { %v3900_v14 = vpop.eup %3899 }
 0x74e   :  { %v3902_v17 = vpop.eup %3901 }
 0x791   :  { %v1542_v41 = vpop.xlane.xlu1 %1541 }
 0x792   :  { %v1543_v45 = vsub.f32 %v4705_v18, %v1542_v41 }
 0x794   :  { %v1544_v46 = vmul.f32 1.442695, %v1543_v45 }
 0x7f9   :  { %v1770_v49 = vpop.f32.mrb[20].mxu0  ;;  %v1862_v57 = vpop.f32.mrb[20].mxu1 }
 0x7fa   :  { %v1771_v60 = vadd.f32 %v4407_v32, %v1770_v49  ;;  %v3203_v63 = vpop.f32.mrb[21].mxu0  ;;  %v3238_v4 = vpop.f32.mrb[21].mxu1 }
 0x7fc   :  { %1774 = vmax.xlane.f32.xlu0 %v1771_v60 }
 0x800   :  { %382 = vadd.xlane.f32.xlu0 %v3898_v8 }
 0x804   :  { %847 = vadd.xlane.f32.xlu0 %v3900_v14 }
 0x808   :  { %1313 = vadd.xlane.f32.xlu0 %v3902_v17 }
 0x819   :  { %v1932_v35 = vpop.f32.mrb[22].mxu0 }
 0x81a   :  { %v1933_v59 = vadd.f32 %v1932_v35, %v1862_v57  ;;  %v3273_v61 = vpop.f32.mrb[23].mxu0 }
 0x81c   :  { %v1936_v62 = vadd.f32 %v4347_v21, %v1933_v59 }
 0x81e   :  { %2025 = vst [vmem:[#allocation13] sm:$0xff] %v1936_v62  ;;  %3307 = vmatmul.mubr.f32.vlgmr.msra.gmra.mrb[22].mxu1 %v1936_v62 }
 0x889   :  { %v1775_v2 = vpop.xlane.xlu0 %1774 }
 0x88a   :  { %v1776_v3 = vsub.f32 %v1771_v60, %v1775_v2 }
 0x88c   :  { %v1777_v6 = vmul.f32 1.442695, %v1776_v3 }
 0x88d   :  { %v383_v7 = vpop.xlane.xlu0 %382 }
 0x88e   :  { %3903 = vpow2.f32 %v1777_v6 }
 0x88f   :  { %3905 = vlog2.f32 %v383_v7 }
 0x891   :  { %v848_v10 = vpop.xlane.xlu0 %847 }
 0x892   :  { %3907 = vlog2.f32 %v848_v10 }
 0x895   :  { %v1314_v11 = vpop.xlane.xlu0 %1313 }
 0x896   :  { %3909 = vlog2.f32 %v1314_v11 }
 0x897   :  { %3911 = vpow2.f32 %v612_v39 }
 0x898   :  { %v3904_v15 = vpop.eup %3903  ;;  %3913 = vpow2.f32 %v1078_v44 }
 0x899   :  { %v3906_v16 = vpop.eup %3905  ;;  %1779 = vadd.xlane.f32.xlu0 %v3904_v15  ;;  %3915 = vpow2.f32 %v1544_v46 }
 0x89a   :  { %v385_v20 = vmul.f32 0.6931472, %v3906_v16 }
 0x89c   :  { %v3908_v22 = vpop.eup %3907  ;;  %v386_v23 = vsub.f32 %v379_v13, %v385_v20 }
 0x89d   :  { %v850_v27 = vmul.f32 0.6931472, %v3908_v22 }
 0x89e   :  { %387 = vst [vmem:[#allocation12] sm:$0xff] %v386_v23 }
 0x89f   :  { %v851_v21 = vsub.f32 %v844_v37, %v850_v27 }
 0x8a0   :  { %v3910_v28 = vpop.eup %3909 }
 0x8a1   :  { %853 = vst [vmem:[#allocation12 + $0x10] sm:$0xff] %v851_v21  ;;  %v1316_v29 = vmul.f32 0.6931472, %v3910_v28  ;;  %v3912_v54 = vpop.eup %3911 }
 0x8a2   :  { %v3914_v51 = vpop.eup %3913 }
 0x8a3   :  { %v1317_v33 = vsub.f32 %v1310_v53, %v1316_v29  ;;  %v3916_v55 = vpop.eup %3915 }
 0x8a5   :  { %1319 = vst [vmem:[#allocation12 + $0x20] sm:$0xff] %v1317_v33 }
 0x8f1   :  { %v2003_v47 = vpop.f32.mrb[22].mxu1 }
 0x8f2   :  { %v2004_v50 = vadd.f32 %v4407_v32, %v2003_v47  ;;  %v3308_v52 = vpop.f32.mrb[23].mxu1 }
 0x8f4   :  { %2007 = vmax.xlane.f32.xlu1 %v2004_v50 }
 0x8f8   :  { %614 = vadd.xlane.f32.xlu1 %v3912_v54 }
 0x8fc   :  { %1080 = vadd.xlane.f32.xlu1 %v3914_v51 }
 0x900   :  { %1546 = vadd.xlane.f32.xlu1 %v3916_v55 }
 0x926   :  { %v1780_v26 = vpop.xlane.xlu0 %1779 }
 0x927   :  { %3917 = vlog2.f32 %v1780_v26 }
 0x931   :  { %v3918_v5 = vpop.eup %3917 }
 0x932   :  { %v1782_v12 = vmul.f32 0.6931472, %v3918_v5 }
 0x934   :  { %v1783_v24 = vsub.f32 %v1776_v3, %v1782_v12 }
 0x936   :  { %1785 = vst [vmem:[#allocation12 + $0x30] sm:$0xff] %v1783_v24 }
 0x981   :  { %v2008_v18 = vpop.xlane.xlu1 %2007 }
 0x982   :  { %v2009_v30 = vsub.f32 %v2004_v50, %v2008_v18 }
 0x984   :  { %v2010_v36 = vmul.f32 1.442695, %v2009_v30 }
 0x985   :  { %v615_v56 = vpop.xlane.xlu1 %614 }
 0x986   :  { %3919 = vpow2.f32 %v2010_v36 }
 0x987   :  { %3921 = vlog2.f32 %v615_v56 }
 0x989   :  { %v1081_v32 = vpop.xlane.xlu1 %1080 }
 0x98a   :  { %3923 = vlog2.f32 %v1081_v32 }
 0x98d   :  { %v1547_v58 = vpop.xlane.xlu1 %1546 }
 0x98e   :  { %3925 = vlog2.f32 %v1547_v58 }
 0x990   :  { %v3920_v42 = vpop.eup %3919 }
 0x991   :  { %v3922_v1 = vpop.eup %3921  ;;  %2012 = vadd.xlane.f32.xlu1 %v3920_v42 }
 0x992   :  { %v617_v9 = vmul.f32 0.6931472, %v3922_v1 }
 0x994   :  { %v3924_v13 = vpop.eup %3923  ;;  %v618_v19 = vsub.f32 %v611_v34, %v617_v9 }
 0x995   :  { %v1083_v25 = vmul.f32 0.6931472, %v3924_v13 }
 0x996   :  { %620 = vst [vmem:[#allocation12 + $0x8] sm:$0xff] %v618_v19 }
 0x997   :  { %v1084_v31 = vsub.f32 %v1077_v40, %v1083_v25 }
 0x998   :  { %v3926_v37 = vpop.eup %3925 }
 0x999   :  { %1086 = vst [vmem:[#allocation12 + $0x18] sm:$0xff] %v1084_v31  ;;  %v1549_v43 = vmul.f32 0.6931472, %v3926_v37 }
 0x99b   :  { %v1550_v48 = vsub.f32 %v1543_v45, %v1549_v43 }
 0x99d   :  { %1552 = vst [vmem:[#allocation12 + $0x28] sm:$0xff] %v1550_v48 }
 0x99e   :  { %4050 = shalt.err (!%p4047_p2)
}
 0x99f   :  { %s4051_s26 = scalar_lea.hbm %s4787_s8, 128 }
 0x9a0   :  { %p4052_p3 = scmp.ne.s32.totalorder %s4787_s8, %s4051_s26  ;;  %p4055_p4 = scmp.lt.u32.totalorder %s4051_s26, %s4787_s8 }
 0x9a2   :  { %p4057_p5 = pnand %p4055_p4, %p4052_p3 }
 0x9a4   :  { %4060 = shalt.err (!%p4057_p5)
}
 0x9a5   :  { %2047 = dma.vmem_to_hbm [thread:$0]  %s2045_s22, 128, %s4787_s8, [#allocation14]  }
 0x9a6   :  { %s4104_s10 = smov [#allocation12]  }
 0x9a7   :  { %s2031_s11 = sshll.u32 %s4104_s10, 4  ;;  %s2032_s11 = int_to_ptr.vmem [resolvable:$true] %s2031_s11 }
 0x9a8   :  { %s4061_s12 = scalar_lea.vmem %s2032_s11, 1024  ;;  %p4066_p7 = scmp.lt.s32.totalorder %s2032_s11, %s2032_s11 }
 0x9a9   :  { %p4062_p6 = scmp.ne.s32.totalorder %s2032_s11, %s4061_s12  ;;  %p4067_p8 = scmp.lt.s32.totalorder %s4061_s12, %s4061_s12 }
 0x9ab   :  { %p4068_p9 = por %p4067_p8, %p4066_p7 }
 0x9ad   :  { %p4069_p10 = pnand %p4068_p9, %p4062_p6 }
 0xa1e   :  { %v2013_v53 = vpop.xlane.xlu1 %2012 }
 0xa1f   :  { %3927 = vlog2.f32 %v2013_v53 }
 0xa29   :  { %v3928_v0 = vpop.eup %3927 }
 0xa2a   :  { %v2015_v49 = vmul.f32 0.6931472, %v3928_v0 }
 0xa2c   :  { %v2016_v57 = vsub.f32 %v2009_v30, %v2015_v49 }
 0xa2e   :  { %2018 = vst [vmem:[#allocation12 + $0x38] sm:$0xff] %v2016_v57 }
 0xa2f   :  { %4072 = shalt.err (!%p4069_p10)
}
 0xa30   :  { %s4073_s8 = scalar_lea.hbm %s4786_s7, 1024 }
 0xa31   :  { %p4074_p11 = scmp.ne.s32.totalorder %s4786_s7, %s4073_s8  ;;  %p4077_p12 = scmp.lt.u32.totalorder %s4073_s8, %s4786_s7 }
 0xa33   :  { %p4079_p13 = pnand %p4077_p12, %p4074_p11 }
 0xa35   :  { %4082 = shalt.err (!%p4079_p13)
}
 0xa36   :  { %2037 = dma.vmem_to_hbm [thread:$0]  %s2032_s11, 1024, %s4786_s7, [#allocation5], %s4096_s28, %s4096_s28, %s4097_s29  }
 0xa37   :  { %4089 = dma.done.wait [#allocation5], 1024  }
 0xa38   :  { %4090 = vsyncadd [#allocation5], 4294966272 }
 0xa39   :  { %4091 = dma.done.wait [#allocation14], 128  }
 0xa3a   :  { %4092 = vsyncadd [#allocation14], 4294967168 }
 0xa3b   :  { %2054 = vsyncpa [#allocation4], 1 }
 0xa3c   :  { %2055 = vsyncpa [#allocation7], 1 }
 0xa3d   :  { %2056 = vsyncpa [#allocation10], 1 }
 0xa3e   :  { %2057 = vsyncpa [#allocation5], 1 }
 0xa3f   :  { %2058 = vsyncpa [#allocation14], 1 }

</bundles_post_ra>
